<compile_context>
chip_gen: v7x
topology: tpu7x:2x2x1
jax: 0.10.0
libtpu: 0.0.40
codegen_flags: <defaults>
</compile_context>

<pallas_src>
import numpy as np

import jax
import jax.numpy as jnp
from jax.experimental import pallas as pl
from jax.experimental.pallas import tpu as pltpu


# ----------------------------------------------------------------------------
# cfg parsing (same logic as parse_cfg, but from an in-script string)
# ----------------------------------------------------------------------------
CFG_TEXT = """
[net]
height=16
width=16
channels=3

[convolutional]
batch_normalize=1
filters=8
size=3
stride=1
pad=1
activation=leaky

[convolutional]
batch_normalize=1
filters=16
size=3
stride=2
pad=1
activation=leaky

[convolutional]
batch_normalize=1
filters=8
size=1
stride=1
pad=1
activation=leaky

[convolutional]
batch_normalize=1
filters=16
size=3
stride=1
pad=1
activation=leaky

[shortcut]
from=-3
activation=linear

[convolutional]
size=1
stride=1
pad=1
filters=21
activation=linear

[yolo]
mask=0,1,2
anchors=10,13, 16,30, 33,23
classes=2
num=3

[route]
layers=-3

[convolutional]
batch_normalize=1
filters=8
size=1
stride=1
pad=1
activation=leaky

[upsample]
stride=2

[route]
layers=-1,-10

[convolutional]
size=1
stride=1
pad=1
filters=21
activation=linear

[yolo]
mask=0,1,2
anchors=10,13, 16,30, 33,23
classes=2
num=3
"""


def parse_cfg_string(text):
    lines = [l.strip() for l in text.split("\n")]
    lines = [l for l in lines if len(l) > 0 and l[0] != "#"]
    block, blocks = {}, []
    for line in lines:
        if line[0] == "[":
            if len(block) != 0:
                blocks.append(block)
                block = {}
            block["type"] = line[1:-1].rstrip()
        else:
            k, v = line.split("=")
            block[k.rstrip()] = v.lstrip()
    blocks.append(block)
    return blocks


# ----------------------------------------------------------------------------
# Glue (pure data movement; XLA fuses it under jit)
# ----------------------------------------------------------------------------
def im2col_slab(x_nchw, ksize, stride, pad):
    """(N, Cin, H, W) -> ((KKC, N*H_out*W_out) bf16 slab, H_out, W_out).

    Slab row ordering: tap-major ((kh, kw) row-major), cin-minor — matches the
    w2d weight layout used below.  Lane ordering: batch-major, hw-minor.
    """
    N, Cin, H, W = x_nchw.shape
    H_out = (H + 2 * pad - ksize) // stride + 1
    W_out = (W + 2 * pad - ksize) // stride + 1
    x = x_nchw.astype(jnp.bfloat16)
    if ksize == 1 and stride == 1 and pad == 0:
        col = x.reshape(N, Cin, H * W)
    else:
        xp = jnp.pad(x, ((0, 0), (0, 0), (pad, pad), (pad, pad)))
        cols = []
        for kh in range(ksize):
            for kw in range(ksize):
                p = jax.lax.slice(
                    xp,
                    (0, 0, kh, kw),
                    (N, Cin, kh + (H_out - 1) * stride + 1,
                     kw + (W_out - 1) * stride + 1),
                    (1, 1, stride, stride))          # (N, Cin, H_out, W_out)
                cols.append(p.reshape(N, Cin, H_out * W_out))
        col = jnp.concatenate(cols, axis=1)           # (N, KKC, HW)
    col = col.transpose(1, 0, 2).reshape(col.shape[1], N * H_out * W_out)
    return col, H_out, W_out


def pad_rows16(slab):
    """Zero-pad the (sublane) K axis of a (K, L) slab to a multiple of 16."""
    r = slab.shape[0]
    rp = -(-r // 16) * 16
    return slab if rp == r else jnp.pad(slab, ((0, rp - r), (0, 0)))


def pad_cols16(w):
    """Zero-pad the (lane) K axis of a (Cout, K) weight to a multiple of 16."""
    c = w.shape[1]
    cp = -(-c // 16) * 16
    return w if cp == c else jnp.pad(w, ((0, 0), (0, cp - c)))


# ----------------------------------------------------------------------------
# Fused conv Pallas kernel: one (or two, for route-split) MXU matmuls +
# folded BN/bias + LeakyReLU (+ residual add) (+ YOLO decode),
# lane-dense (Cout, N*HW) output, single-step grid.
# ----------------------------------------------------------------------------
def _make_conv_kernel(n_in, leaky, has_res, has_yolo):
    def kernel(*refs):
        idx = 0
        y = None
        for _ in range(n_in):
            x_ref, w_ref = refs[idx], refs[idx + 1]
            idx += 2
            part = jnp.dot(w_ref[...], x_ref[...],
                           preferred_element_type=jnp.float32)
            y = part if y is None else y + part
        shift_ref = refs[idx]
        idx += 1
        # scale was pre-folded into the weights; only the shift remains.
        y = y + shift_ref[...]
        if leaky:
            y = jnp.maximum(y, 0.1 * y)
        if has_res:
            res_ref = refs[idx]
            idx += 1
            y = y + res_ref[...].astype(jnp.float32)
        if has_yolo:
            expm_ref, mul_ref, off_ref = refs[idx:idx + 3]
            idx += 3
            # Fused YOLO decode.  exp is restricted to the w/h rows (other
            # rows clamped to 0 before exp so no inf intermediates).
            m = expm_ref[...] > 0.0                   # (Cout, 1) wh-row mask
            e = jnp.exp(jnp.where(m, y, 0.0))
            s = jax.nn.sigmoid(y)
            #   xy rows:   (sigmoid + grid_offset) * stride
            #   wh rows:   exp * anchor
            #   conf/cls:  sigmoid
            y = jnp.where(m, e, s + off_ref[...]) * mul_ref[...]
        o_ref = refs[-1]
        o_ref[...] = y.astype(o_ref.dtype)
    return kernel


def conv_block(parts, shift, *, leaky, residual=None, yolo_aux=None,
               out_dtype=jnp.bfloat16):
    """parts: list of ((Ki, L) bf16 slab, (Cout, Ki) bf16 weight) pairs.

    Returns the (Cout, L) output slab (L = N*HW, batch folded into lanes).
    """
    L = parts[0][0].shape[1]
    Cout = parts[0][1].shape[0]

    inputs, in_specs = [], []
    flops = 0
    bytes_accessed = 0
    for xc, w in parts:
        inputs += [xc, w]
        in_specs += [pl.BlockSpec(xc.shape, lambda i: (0, 0)),
                     pl.BlockSpec(w.shape, lambda i: (0, 0))]
        flops += 2 * Cout * xc.shape[0] * L
        bytes_accessed += xc.size * 2 + w.size * 2

    inputs.append(shift)
    in_specs.append(pl.BlockSpec((Cout, 1), lambda i: (0, 0)))
    bytes_accessed += Cout * 4

    has_res = residual is not None
    if has_res:
        inputs.append(residual)                            # (Cout, L) bf16
        in_specs.append(pl.BlockSpec((Cout, L), lambda i: (0, 0)))
        bytes_accessed += residual.size * residual.dtype.itemsize

    has_yolo = yolo_aux is not None
    transcendentals = 0
    if has_yolo:
        expm, mul, off = yolo_aux
        inputs += [expm, mul, off]
        in_specs += [pl.BlockSpec((Cout, 1), lambda i: (0, 0)),
                     pl.BlockSpec((Cout, 1), lambda i: (0, 0)),
                     pl.BlockSpec((Cout, L), lambda i: (0, 0))]
        bytes_accessed += (2 * Cout + Cout * L) * 4
        transcendentals = 2 * Cout * L

    bytes_accessed += Cout * L * jnp.dtype(out_dtype).itemsize

    kern = _make_conv_kernel(len(parts), leaky, has_res, has_yolo)
    return pl.pallas_call(
        kern,
        out_shape=jax.ShapeDtypeStruct((Cout, L), out_dtype),
        grid=(1,),
        in_specs=in_specs,
        out_specs=pl.BlockSpec((Cout, L), lambda i: (0, 0)),
        cost_estimate=pl.CostEstimate(flops=int(flops),
                                      transcendentals=int(transcendentals),
                                      bytes_accessed=int(bytes_accessed)),
    )(*inputs)


# ----------------------------------------------------------------------------
# YOLO decode constants (trace-time numpy -> jit constants), batch folded
# into the lane axis (batch-major, hw-minor) to match the slab layout.
# ----------------------------------------------------------------------------
def yolo_decode_aux(G, anchors, num_classes, stride, N):
    A = len(anchors)
    bbox = 5 + num_classes
    C = A * bbox
    attr = np.arange(C) % bbox
    is_wh = (attr == 2) | (attr == 3)

    mul = np.ones((C, 1), np.float32)
    mul[(attr == 0) | (attr == 1), 0] = float(stride)
    for a in range(A):
        mul[a * bbox + 2, 0] = float(anchors[a][0])   # exp*(anc/stride)*stride
        mul[a * bbox + 3, 0] = float(anchors[a][1])

    gy, gx = np.meshgrid(np.arange(G), np.arange(G), indexing="ij")
    ox = gx.reshape(-1).astype(np.float32)
    oy = gy.reshape(-1).astype(np.float32)
    off = np.zeros((C, G * G), np.float32)
    off[attr == 0] = ox
    off[attr == 1] = oy
    off = np.tile(off, (1, N))                        # lanes are (n, hw)

    expm = is_wh.astype(np.float32).reshape(C, 1)
    return jnp.asarray(expm), jnp.asarray(mul), jnp.asarray(off)


# ----------------------------------------------------------------------------
# Darknet in JAX (mirrors create_modules / Darknet.forward)
# ----------------------------------------------------------------------------
class DarknetJax:
    def __init__(self, blocks, key):
        self.blocks = blocks
        self.net_info = blocks[0]
        self.modules = blocks[1:]
        self.params = []

        prev_filters = int(self.net_info.get("channels", 3))
        output_filters = []
        filters = prev_filters
        for index, b in enumerate(self.modules):
            p = None
            if b["type"] == "convolutional":
                bn = int(b.get("batch_normalize", 0))
                filters = int(b["filters"])
                size = int(b["size"])
                key, k1, k2, k3 = jax.random.split(key, 4)
                # Weight stored pre-reshaped for the im2col matmul:
                # w2d[cout, (kh*KW + kw)*Cin + cin].
                w2d = 0.1 * jax.random.normal(
                    k1, (filters, size * size * prev_filters), jnp.float32)
                if bn:
                    gamma = 1.0 + 0.1 * jax.random.normal(
                        k2, (filters,), jnp.float32)
                    beta = 0.1 * jax.random.normal(k3, (filters,), jnp.float32)
                    # eval-mode BN, running_mean=0, running_var=1, eps=1e-5
                    scale = gamma / jnp.sqrt(1.0 + 1e-5)
                    shift = beta
                else:
                    bias = 0.1 * jax.random.normal(k2, (filters,), jnp.float32)
                    scale = jnp.ones((filters,), jnp.float32)
                    shift = bias
                # Pre-fold the BN/bias scale into the weight rows (in f32),
                # then cast to bf16 for the MXU.
                w2d = (w2d * scale[:, None]).astype(jnp.bfloat16)
                p = dict(w=w2d, shift=shift.reshape(filters, 1))
            elif b["type"] == "route":
                layers = [int(v) for v in b["layers"].split(",")]
                start = layers[0]
                end = layers[1] if len(layers) > 1 else 0
                if start > 0:
                    start -= index
                if end > 0:
                    end -= index
                if end < 0:
                    filters = (output_filters[index + start]
                               + output_filters[index + end])
                else:
                    filters = output_filters[index + start]
            # shortcut / upsample / yolo: filters unchanged (matches reference)
            self.params.append(p)
            prev_filters = filters
            output_filters.append(filters)

        self._res_src, self._yolo_fused = self._build_fusion_plan()
        self._forward_jit = jax.jit(self._forward)

    # -- static fusion plan: shortcut / yolo fused into the preceding conv
    #    only when no other layer explicitly references that conv's output ----
    def _build_fusion_plan(self):
        mods = self.modules
        refs = {}
        for j, b in enumerate(mods):
            if b["type"] == "route":
                for l in [int(v) for v in b["layers"].split(",")]:
                    k = l if l > 0 else j + l
                    refs.setdefault(k, []).append(j)
            elif b["type"] == "shortcut":
                frm = int(b["from"])
                refs.setdefault(j - 1, []).append(j)
                refs.setdefault(j + frm, []).append(j)
        res_src, yolo_fused = {}, set()
        for i, b in enumerate(mods):
            if b["type"] != "convolutional" or i + 1 >= len(mods):
                continue
            nxt = mods[i + 1]["type"]
            if nxt == "shortcut":
                consumers = [j for j in refs.get(i, []) if j != i + 1]
                src = (i + 1) + int(mods[i + 1]["from"])
                if not consumers and mods[src]["type"] == "convolutional":
                    res_src[i] = src
            elif nxt == "yolo":
                if not refs.get(i, []):
                    yolo_fused.add(i)
        return res_src, yolo_fused

    @staticmethod
    def _yolo_cfg(b):
        mask = [int(v) for v in b["mask"].split(",")]
        a = [int(v) for v in b["anchors"].split(",")]
        anchors = [(a[j], a[j + 1]) for j in range(0, len(a), 2)]
        anchors = [anchors[m] for m in mask]
        return anchors, int(b["classes"])

    # -- jitted forward -------------------------------------------------------
    # Activations live in "slab" layout between layers: a list of
    # (slab (C, N*HW), C) parts plus (H, W).  Route outputs keep their sources
    # as separate parts so the consuming 1x1 conv never materializes a concat.
    def _forward(self, x_nchw):
        N = x_nchw.shape[0]
        mods = self.modules
        outputs = {}
        detections = None
        input_dim = int(self.net_info["height"])

        def slab_to_nchw(parts, H, W):
            arrs = []
            for slab, C in parts:
                arrs.append(slab.reshape(C, N, H, W).transpose(1, 0, 2, 3))
            return arrs[0] if len(arrs) == 1 else jnp.concatenate(arrs, axis=1)

        def materialize(parts):
            return (parts[0][0] if len(parts) == 1
                    else jnp.concatenate([s for s, _ in parts], axis=0))

        # network input in slab layout
        Cin0 = x_nchw.shape[1]
        H0, W0 = x_nchw.shape[2], x_nchw.shape[3]
        x0 = x_nchw.astype(jnp.bfloat16).transpose(1, 0, 2, 3)
        x = ([(x0.reshape(Cin0, N * H0 * W0), Cin0)], H0, W0)

        for i, b in enumerate(mods):
            t = b["type"]
            if t == "convolutional":
                p = self.params[i]
                size = int(b["size"])
                stride = int(b["stride"])
                pad = (size - 1) // 2 if int(b["pad"]) else 0
                leaky = (b["activation"] == "leaky")
                parts_in, H, W = x
                w_full = p["w"]
                Cout = w_full.shape[0]

                if size == 1 and stride == 1 and pad == 0:
                    # 1x1 conv: consume each slab part directly (split dots
                    # replace the HBM route-concat).
                    H_out, W_out = H, W
                    call_parts = []
                    col_off = 0
                    for slab, C in parts_in:
                        w_sub = w_full[:, col_off:col_off + C]
                        col_off += C
                        call_parts.append((pad_rows16(slab),
                                           pad_cols16(w_sub)))
                else:
                    xn = slab_to_nchw(parts_in, H, W)
                    xcol, H_out, W_out = im2col_slab(xn, size, stride, pad)
                    call_parts = [(pad_rows16(xcol), pad_cols16(w_full))]

                residual = None
                if i in self._res_src:
                    rparts, _, _ = outputs[self._res_src[i]]
                    residual = rparts[0][0]          # (Cout, L) bf16 slab

                yolo_aux = None
                out_dtype = jnp.bfloat16
                if i in self._yolo_fused:
                    anchors, num_classes = self._yolo_cfg(mods[i + 1])
                    yolo_aux = yolo_decode_aux(
                        H_out, anchors, num_classes, input_dim // H_out, N)
                    out_dtype = jnp.float32          # detection heads stay f32

                y = conv_block(call_parts, p["shift"], leaky=leaky,
                               residual=residual, yolo_aux=yolo_aux,
                               out_dtype=out_dtype)
                x = ([(y, Cout)], H_out, W_out)

            elif t == "upsample":
                s = int(b["stride"])
                parts_in, H, W = x
                new_parts = []
                for slab, C in parts_in:
                    a = slab.reshape(C, N, H, W)
                    a = jnp.repeat(jnp.repeat(a, s, axis=2), s, axis=3)
                    new_parts.append((a.reshape(C, N * H * s * W * s), C))
                x = (new_parts, H * s, W * s)

            elif t == "route":
                layers = [int(v) for v in b["layers"].split(",")]
                if layers[0] > 0:
                    layers[0] -= i
                if len(layers) == 1:
                    x = outputs[i + layers[0]]
                else:
                    if layers[1] > 0:
                        layers[1] -= i
                    p1, H, W = outputs[i + layers[0]]
                    p2, _, _ = outputs[i + layers[1]]
                    # channel concat kept as separate parts (no HBM concat)
                    x = (list(p1) + list(p2), H, W)

            elif t == "shortcut":
                if (i - 1) in self._res_src:
                    pass  # residual add already fused into the previous conv
                else:
                    # TODO(synk): unfused fallback (never taken for this cfg)
                    frm = int(b["from"])
                    pa, H, W = outputs[i - 1]
                    pb, _, _ = outputs[i + frm]
                    sa, sb = materialize(pa), materialize(pb)
                    Ctot = sum(c for _, c in pa)
                    x = ([(sa + sb, Ctot)], H, W)

            elif t == "yolo":
                anchors, num_classes = self._yolo_cfg(b)
                A = len(anchors)
                bbox = 5 + num_classes
                parts_in, G, _ = x
                slab = materialize(parts_in)
                if (i - 1) not in self._yolo_fused:
                    # TODO(synk): unfused decode fallback in plain JAX (never
                    # taken for this cfg; decode normally runs fused in the
                    # preceding conv's Pallas epilogue).
                    expm, mul, off = yolo_decode_aux(
                        G, anchors, num_classes, input_dim // G, N)
                    flat = slab.astype(jnp.float32)
                    m = expm > 0
                    e = jnp.exp(jnp.where(m, flat, 0.0))
                    s = jax.nn.sigmoid(flat)
                    slab = jnp.where(m, e, s + off) * mul
                # (A*bbox, N*G*G) -> (N, G*G*A, bbox), cell-major/anchor-minor
                det = slab.reshape(A, bbox, N, G * G).transpose(2, 3, 0, 1)
                det = det.reshape(N, G * G * A, bbox)
                detections = det if detections is None else jnp.concatenate(
                    [detections, det], axis=1)
                x = ([(slab, A * bbox)], G, G)

            outputs[i] = x
        return detections

    def forward(self, x_nchw):
        return self._forward_jit(x_nchw)


# ----------------------------------------------------------------------------
# main
# ----------------------------------------------------------------------------
if __name__ == "__main__":
    key = jax.random.PRNGKey(0)
    kx, kp = jax.random.split(key)
    # PyTorch-convention NCHW input: batch=2, channels=3, 16x16 spatial
    x = jax.random.normal(kx, (2, 3, 16, 16), jnp.float32)

    blocks = parse_cfg_string(CFG_TEXT)
    net = DarknetJax(blocks, kp)

    det = net.forward(x)
    det = jax.block_until_ready(det)

    # two yolo heads: 8*8*3 + 16*16*3 boxes, each (5 + 2 classes) attrs
    assert det.shape == (2, 960, 7), det.shape
    assert bool(jnp.all(jnp.isfinite(det)))
    print("KERNEL_OK")
</pallas_src>

<mosaic_0001>
module attributes {stable_mosaic.version = 11 : i64} {
  func.func @kernel(%arg0: i32, %arg1: memref<32x512xbf16, #tpu.memory_space<vmem>>, %arg2: memref<8x32xbf16, #tpu.memory_space<vmem>>, %arg3: memref<8x1xf32, #tpu.memory_space<vmem>>, %arg4: memref<8x512xbf16, #tpu.memory_space<vmem>>) attributes {dimension_semantics = [#tpu.dimension_semantics<arbitrary>], iteration_bounds = array<i64: 1>, scalar_prefetch = 0 : i64, scratch_operands = 0 : i64, tpu.core_type = #tpu.core_type<tc>, window_params = [{pipeline_mode = #tpu.pipeline_mode<synchronous>, transform_indices = @transform_0, window_bounds = array<i64: 32, 512>}, {pipeline_mode = #tpu.pipeline_mode<synchronous>, transform_indices = @transform_1, window_bounds = array<i64: 8, 32>}, {pipeline_mode = #tpu.pipeline_mode<synchronous>, transform_indices = @transform_2, window_bounds = array<i64: 8, 1>}, {pipeline_mode = #tpu.pipeline_mode<synchronous>, transform_indices = @transform_3, window_bounds = array<i64: 8, 512>}]} {
    %c0 = arith.constant 0 : index
    %c0_0 = arith.constant 0 : index
    %0 = vector.load %arg2[%c0, %c0_0] : memref<8x32xbf16, #tpu.memory_space<vmem>>, vector<8x32xbf16>
    %c0_1 = arith.constant 0 : index
    %c0_2 = arith.constant 0 : index
    %1 = vector.load %arg1[%c0_1, %c0_2] : memref<32x512xbf16, #tpu.memory_space<vmem>>, vector<32x512xbf16>
    %cst = arith.constant dense<0.000000e+00> : vector<8x512xf32>
    %2 = tpu.matmul %0, %1, %cst {dimension_numbers = #tpu.dot_dimension_numbers<[1], [0], [0], [1], [0, 0, 1, 1], [], []>} : vector<8x32xbf16>, vector<32x512xbf16>, vector<8x512xf32> -> vector<8x512xf32>
    %c0_3 = arith.constant 0 : index
    %c0_4 = arith.constant 0 : index
    %3 = vector.load %arg3[%c0_3, %c0_4] : memref<8x1xf32, #tpu.memory_space<vmem>>, vector<8x1xf32>
    %4 = vector.broadcast %3 : vector<8x1xf32> to vector<8x512xf32>
    %5 = arith.addf %2, %4 : vector<8x512xf32>
    %cst_5 = arith.constant 1.000000e-01 : f32
    %6 = vector.broadcast %cst_5 : f32 to vector<8x512xf32>
    %7 = arith.mulf %6, %5 : vector<8x512xf32>
    %8 = arith.maximumf %5, %7 : vector<8x512xf32>
    %9 = arith.truncf %8 : vector<8x512xf32> to vector<8x512xbf16>
    %c0_6 = arith.constant 0 : index
    %c0_7 = arith.constant 0 : index
    %10 = vector.load %arg4[%c0_6, %c0_7] : memref<8x512xbf16, #tpu.memory_space<vmem>>, vector<8x512xbf16>
    tpu.vector_store %arg4[%c0_6, %c0_7], %9 {strides = array<i32>} : memref<8x512xbf16, #tpu.memory_space<vmem>>, vector<8x512xbf16>,
    return
  }
  func.func @transform_0(%arg0: i32) -> (i32, i32) {
    %c0_i32 = arith.constant 0 : i32
    %c0_i32_0 = arith.constant 0 : i32
    %c0_i32_1 = arith.constant 0 : i32
    return %c0_i32, %c0_i32_0 : i32, i32
  }
  func.func @transform_1(%arg0: i32) -> (i32, i32) {
    %c0_i32 = arith.constant 0 : i32
    %c0_i32_0 = arith.constant 0 : i32
    %c0_i32_1 = arith.constant 0 : i32
    return %c0_i32, %c0_i32_0 : i32, i32
  }
  func.func @transform_2(%arg0: i32) -> (i32, i32) {
    %c0_i32 = arith.constant 0 : i32
    %c0_i32_0 = arith.constant 0 : i32
    %c0_i32_1 = arith.constant 0 : i32
    return %c0_i32, %c0_i32_0 : i32, i32
  }
  func.func @transform_3(%arg0: i32) -> (i32, i32) {
    %c0_i32 = arith.constant 0 : i32
    %c0_i32_0 = arith.constant 0 : i32
    %c0_i32_1 = arith.constant 0 : i32
    return %c0_i32, %c0_i32_0 : i32, i32
  }
}

module attributes {stable_mosaic.version = 11 : i64} {
  func.func @kernel(%arg0: i32, %arg1: memref<16x128xbf16, #tpu.memory_space<vmem>>, %arg2: memref<8x16xbf16, #tpu.memory_space<vmem>>, %arg3: memref<8x1xf32, #tpu.memory_space<vmem>>, %arg4: memref<8x128xbf16, #tpu.memory_space<vmem>>) attributes {dimension_semantics = [#tpu.dimension_semantics<arbitrary>], iteration_bounds = array<i64: 1>, scalar_prefetch = 0 : i64, scratch_operands = 0 : i64, tpu.core_type = #tpu.core_type<tc>, window_params = [{pipeline_mode = #tpu.pipeline_mode<synchronous>, transform_indices = @transform_0, window_bounds = array<i64: 16, 128>}, {pipeline_mode = #tpu.pipeline_mode<synchronous>, transform_indices = @transform_1, window_bounds = array<i64: 8, 16>}, {pipeline_mode = #tpu.pipeline_mode<synchronous>, transform_indices = @transform_2, window_bounds = array<i64: 8, 1>}, {pipeline_mode = #tpu.pipeline_mode<synchronous>, transform_indices = @transform_3, window_bounds = array<i64: 8, 128>}]} {
    %c0 = arith.constant 0 : index
    %c0_0 = arith.constant 0 : index
    %0 = vector.load %arg2[%c0, %c0_0] : memref<8x16xbf16, #tpu.memory_space<vmem>>, vector<8x16xbf16>
    %c0_1 = arith.constant 0 : index
    %c0_2 = arith.constant 0 : index
    %1 = vector.load %arg1[%c0_1, %c0_2] : memref<16x128xbf16, #tpu.memory_space<vmem>>, vector<16x128xbf16>
    %cst = arith.constant dense<0.000000e+00> : vector<8x128xf32>
    %2 = tpu.matmul %0, %1, %cst {dimension_numbers = #tpu.dot_dimension_numbers<[1], [0], [0], [1], [0, 0, 1, 1], [], []>} : vector<8x16xbf16>, vector<16x128xbf16>, vector<8x128xf32> -> vector<8x128xf32>
    %c0_3 = arith.constant 0 : index
    %c0_4 = arith.constant 0 : index
    %3 = vector.load %arg3[%c0_3, %c0_4] : memref<8x1xf32, #tpu.memory_space<vmem>>, vector<8x1xf32>
    %4 = vector.broadcast %3 : vector<8x1xf32> to vector<8x128xf32>
    %5 = arith.addf %2, %4 : vector<8x128xf32>
    %cst_5 = arith.constant 1.000000e-01 : f32
    %6 = vector.broadcast %cst_5 : f32 to vector<8x128xf32>
    %7 = arith.mulf %6, %5 : vector<8x128xf32>
    %8 = arith.maximumf %5, %7 : vector<8x128xf32>
    %9 = arith.truncf %8 : vector<8x128xf32> to vector<8x128xbf16>
    %c0_6 = arith.constant 0 : index
    %c0_7 = arith.constant 0 : index
    %10 = vector.load %arg4[%c0_6, %c0_7] : memref<8x128xbf16, #tpu.memory_space<vmem>>, vector<8x128xbf16>
    tpu.vector_store %arg4[%c0_6, %c0_7], %9 {strides = array<i32>} : memref<8x128xbf16, #tpu.memory_space<vmem>>, vector<8x128xbf16>,
    return
  }
  func.func @transform_0(%arg0: i32) -> (i32, i32) {
    %c0_i32 = arith.constant 0 : i32
    %c0_i32_0 = arith.constant 0 : i32
    %c0_i32_1 = arith.constant 0 : i32
    return %c0_i32, %c0_i32_0 : i32, i32
  }
  func.func @transform_1(%arg0: i32) -> (i32, i32) {
    %c0_i32 = arith.constant 0 : i32
    %c0_i32_0 = arith.constant 0 : i32
    %c0_i32_1 = arith.constant 0 : i32
    return %c0_i32, %c0_i32_0 : i32, i32
  }
  func.func @transform_2(%arg0: i32) -> (i32, i32) {
    %c0_i32 = arith.constant 0 : i32
    %c0_i32_0 = arith.constant 0 : i32
    %c0_i32_1 = arith.constant 0 : i32
    return %c0_i32, %c0_i32_0 : i32, i32
  }
  func.func @transform_3(%arg0: i32) -> (i32, i32) {
    %c0_i32 = arith.constant 0 : i32
    %c0_i32_0 = arith.constant 0 : i32
    %c0_i32_1 = arith.constant 0 : i32
    return %c0_i32, %c0_i32_0 : i32, i32
  }
}

module attributes {stable_mosaic.version = 11 : i64} {
  func.func @kernel(%arg0: i32, %arg1: memref<80x128xbf16, #tpu.memory_space<vmem>>, %arg2: memref<16x80xbf16, #tpu.memory_space<vmem>>, %arg3: memref<16x1xf32, #tpu.memory_space<vmem>>, %arg4: memref<16x128xbf16, #tpu.memory_space<vmem>>) attributes {dimension_semantics = [#tpu.dimension_semantics<arbitrary>], iteration_bounds = array<i64: 1>, scalar_prefetch = 0 : i64, scratch_operands = 0 : i64, tpu.core_type = #tpu.core_type<tc>, window_params = [{pipeline_mode = #tpu.pipeline_mode<synchronous>, transform_indices = @transform_0, window_bounds = array<i64: 80, 128>}, {pipeline_mode = #tpu.pipeline_mode<synchronous>, transform_indices = @transform_1, window_bounds = array<i64: 16, 80>}, {pipeline_mode = #tpu.pipeline_mode<synchronous>, transform_indices = @transform_2, window_bounds = array<i64: 16, 1>}, {pipeline_mode = #tpu.pipeline_mode<synchronous>, transform_indices = @transform_3, window_bounds = array<i64: 16, 128>}]} {
    %c0 = arith.constant 0 : index
    %c0_0 = arith.constant 0 : index
    %0 = vector.load %arg2[%c0, %c0_0] : memref<16x80xbf16, #tpu.memory_space<vmem>>, vector<16x80xbf16>
    %c0_1 = arith.constant 0 : index
    %c0_2 = arith.constant 0 : index
    %1 = vector.load %arg1[%c0_1, %c0_2] : memref<80x128xbf16, #tpu.memory_space<vmem>>, vector<80x128xbf16>
    %cst = arith.constant dense<0.000000e+00> : vector<16x128xf32>
    %2 = tpu.matmul %0, %1, %cst {dimension_numbers = #tpu.dot_dimension_numbers<[1], [0], [0], [1], [0, 0, 1, 1], [], []>} : vector<16x80xbf16>, vector<80x128xbf16>, vector<16x128xf32> -> vector<16x128xf32>
    %c0_3 = arith.constant 0 : index
    %c0_4 = arith.constant 0 : index
    %3 = vector.load %arg3[%c0_3, %c0_4] : memref<16x1xf32, #tpu.memory_space<vmem>>, vector<16x1xf32>
    %4 = vector.broadcast %3 : vector<16x1xf32> to vector<16x128xf32>
    %5 = arith.addf %2, %4 : vector<16x128xf32>
    %cst_5 = arith.constant 1.000000e-01 : f32
    %6 = vector.broadcast %cst_5 : f32 to vector<16x128xf32>
    %7 = arith.mulf %6, %5 : vector<16x128xf32>
    %8 = arith.maximumf %5, %7 : vector<16x128xf32>
    %9 = arith.truncf %8 : vector<16x128xf32> to vector<16x128xbf16>
    %c0_6 = arith.constant 0 : index
    %c0_7 = arith.constant 0 : index
    %10 = vector.load %arg4[%c0_6, %c0_7] : memref<16x128xbf16, #tpu.memory_space<vmem>>, vector<16x128xbf16>
    tpu.vector_store %arg4[%c0_6, %c0_7], %9 {strides = array<i32>} : memref<16x128xbf16, #tpu.memory_space<vmem>>, vector<16x128xbf16>,
    return
  }
  func.func @transform_0(%arg0: i32) -> (i32, i32) {
    %c0_i32 = arith.constant 0 : i32
    %c0_i32_0 = arith.constant 0 : i32
    %c0_i32_1 = arith.constant 0 : i32
    return %c0_i32, %c0_i32_0 : i32, i32
  }
  func.func @transform_1(%arg0: i32) -> (i32, i32) {
    %c0_i32 = arith.constant 0 : i32
    %c0_i32_0 = arith.constant 0 : i32
    %c0_i32_1 = arith.constant 0 : i32
    return %c0_i32, %c0_i32_0 : i32, i32
  }
  func.func @transform_2(%arg0: i32) -> (i32, i32) {
    %c0_i32 = arith.constant 0 : i32
    %c0_i32_0 = arith.constant 0 : i32
    %c0_i32_1 = arith.constant 0 : i32
    return %c0_i32, %c0_i32_0 : i32, i32
  }
  func.func @transform_3(%arg0: i32) -> (i32, i32) {
    %c0_i32 = arith.constant 0 : i32
    %c0_i32_0 = arith.constant 0 : i32
    %c0_i32_1 = arith.constant 0 : i32
    return %c0_i32, %c0_i32_0 : i32, i32
  }
}

module attributes {stable_mosaic.version = 11 : i64} {
  func.func @kernel(%arg0: i32, %arg1: memref<80x128xbf16, #tpu.memory_space<vmem>>, %arg2: memref<16x80xbf16, #tpu.memory_space<vmem>>, %arg3: memref<16x1xf32, #tpu.memory_space<vmem>>, %arg4: memref<16x128xbf16, #tpu.memory_space<vmem>>, %arg5: memref<16x128xbf16, #tpu.memory_space<vmem>>) attributes {dimension_semantics = [#tpu.dimension_semantics<arbitrary>], iteration_bounds = array<i64: 1>, scalar_prefetch = 0 : i64, scratch_operands = 0 : i64, tpu.core_type = #tpu.core_type<tc>, window_params = [{pipeline_mode = #tpu.pipeline_mode<synchronous>, transform_indices = @transform_0, window_bounds = array<i64: 80, 128>}, {pipeline_mode = #tpu.pipeline_mode<synchronous>, transform_indices = @transform_1, window_bounds = array<i64: 16, 80>}, {pipeline_mode = #tpu.pipeline_mode<synchronous>, transform_indices = @transform_2, window_bounds = array<i64: 16, 1>}, {pipeline_mode = #tpu.pipeline_mode<synchronous>, transform_indices = @transform_3, window_bounds = array<i64: 16, 128>}, {pipeline_mode = #tpu.pipeline_mode<synchronous>, transform_indices = @transform_4, window_bounds = array<i64: 16, 128>}]} {
    %c0 = arith.constant 0 : index
    %c0_0 = arith.constant 0 : index
    %0 = vector.load %arg2[%c0, %c0_0] : memref<16x80xbf16, #tpu.memory_space<vmem>>, vector<16x80xbf16>
    %c0_1 = arith.constant 0 : index
    %c0_2 = arith.constant 0 : index
    %1 = vector.load %arg1[%c0_1, %c0_2] : memref<80x128xbf16, #tpu.memory_space<vmem>>, vector<80x128xbf16>
    %cst = arith.constant dense<0.000000e+00> : vector<16x128xf32>
    %2 = tpu.matmul %0, %1, %cst {dimension_numbers = #tpu.dot_dimension_numbers<[1], [0], [0], [1], [0, 0, 1, 1], [], []>} : vector<16x80xbf16>, vector<80x128xbf16>, vector<16x128xf32> -> vector<16x128xf32>
    %c0_3 = arith.constant 0 : index
    %c0_4 = arith.constant 0 : index
    %3 = vector.load %arg3[%c0_3, %c0_4] : memref<16x1xf32, #tpu.memory_space<vmem>>, vector<16x1xf32>
    %4 = vector.broadcast %3 : vector<16x1xf32> to vector<16x128xf32>
    %5 = arith.addf %2, %4 : vector<16x128xf32>
    %cst_5 = arith.constant 1.000000e-01 : f32
    %6 = vector.broadcast %cst_5 : f32 to vector<16x128xf32>
    %7 = arith.mulf %6, %5 : vector<16x128xf32>
    %8 = arith.maximumf %5, %7 : vector<16x128xf32>
    %c0_6 = arith.constant 0 : index
    %c0_7 = arith.constant 0 : index
    %9 = vector.load %arg4[%c0_6, %c0_7] : memref<16x128xbf16, #tpu.memory_space<vmem>>, vector<16x128xbf16>
    %10 = arith.extf %9 : vector<16x128xbf16> to vector<16x128xf32>
    %11 = arith.addf %8, %10 : vector<16x128xf32>
    %12 = arith.truncf %11 : vector<16x128xf32> to vector<16x128xbf16>
    %c0_8 = arith.constant 0 : index
    %c0_9 = arith.constant 0 : index
    %13 = vector.load %arg5[%c0_8, %c0_9] : memref<16x128xbf16, #tpu.memory_space<vmem>>, vector<16x128xbf16>
    tpu.vector_store %arg5[%c0_8, %c0_9], %12 {strides = array<i32>} : memref<16x128xbf16, #tpu.memory_space<vmem>>, vector<16x128xbf16>,
    return
  }
  func.func @transform_0(%arg0: i32) -> (i32, i32) {
    %c0_i32 = arith.constant 0 : i32
    %c0_i32_0 = arith.constant 0 : i32
    %c0_i32_1 = arith.constant 0 : i32
    return %c0_i32, %c0_i32_0 : i32, i32
  }
  func.func @transform_1(%arg0: i32) -> (i32, i32) {
    %c0_i32 = arith.constant 0 : i32
    %c0_i32_0 = arith.constant 0 : i32
    %c0_i32_1 = arith.constant 0 : i32
    return %c0_i32, %c0_i32_0 : i32, i32
  }
  func.func @transform_2(%arg0: i32) -> (i32, i32) {
    %c0_i32 = arith.constant 0 : i32
    %c0_i32_0 = arith.constant 0 : i32
    %c0_i32_1 = arith.constant 0 : i32
    return %c0_i32, %c0_i32_0 : i32, i32
  }
  func.func @transform_3(%arg0: i32) -> (i32, i32) {
    %c0_i32 = arith.constant 0 : i32
    %c0_i32_0 = arith.constant 0 : i32
    %c0_i32_1 = arith.constant 0 : i32
    return %c0_i32, %c0_i32_0 : i32, i32
  }
  func.func @transform_4(%arg0: i32) -> (i32, i32) {
    %c0_i32 = arith.constant 0 : i32
    %c0_i32_0 = arith.constant 0 : i32
    %c0_i32_1 = arith.constant 0 : i32
    return %c0_i32, %c0_i32_0 : i32, i32
  }
}

module attributes {stable_mosaic.version = 11 : i64} {
  func.func @kernel(%arg0: i32, %arg1: memref<16x512xbf16, #tpu.memory_space<vmem>>, %arg2: memref<21x16xbf16, #tpu.memory_space<vmem>>, %arg3: memref<16x512xbf16, #tpu.memory_space<vmem>>, %arg4: memref<21x16xbf16, #tpu.memory_space<vmem>>, %arg5: memref<21x1xf32, #tpu.memory_space<vmem>>, %arg6: memref<21x1xf32, #tpu.memory_space<vmem>>, %arg7: memref<21x1xf32, #tpu.memory_space<vmem>>, %arg8: memref<21x512xf32, #tpu.memory_space<vmem>>, %arg9: memref<21x512xf32, #tpu.memory_space<vmem>>) attributes {dimension_semantics = [#tpu.dimension_semantics<arbitrary>], iteration_bounds = array<i64: 1>, scalar_prefetch = 0 : i64, scratch_operands = 0 : i64, tpu.core_type = #tpu.core_type<tc>, window_params = [{pipeline_mode = #tpu.pipeline_mode<synchronous>, transform_indices = @transform_0, window_bounds = array<i64: 16, 512>}, {pipeline_mode = #tpu.pipeline_mode<synchronous>, transform_indices = @transform_1, window_bounds = array<i64: 21, 16>}, {pipeline_mode = #tpu.pipeline_mode<synchronous>, transform_indices = @transform_2, window_bounds = array<i64: 16, 512>}, {pipeline_mode = #tpu.pipeline_mode<synchronous>, transform_indices = @transform_3, window_bounds = array<i64: 21, 16>}, {pipeline_mode = #tpu.pipeline_mode<synchronous>, transform_indices = @transform_4, window_bounds = array<i64: 21, 1>}, {pipeline_mode = #tpu.pipeline_mode<synchronous>, transform_indices = @transform_5, window_bounds = array<i64: 21, 1>}, {pipeline_mode = #tpu.pipeline_mode<synchronous>, transform_indices = @transform_6, window_bounds = array<i64: 21, 1>}, {pipeline_mode = #tpu.pipeline_mode<synchronous>, transform_indices = @transform_7, window_bounds = array<i64: 21, 512>}, {pipeline_mode = #tpu.pipeline_mode<synchronous>, transform_indices = @transform_8, window_bounds = array<i64: 21, 512>}]} {
    %c0 = arith.constant 0 : index
    %c0_0 = arith.constant 0 : index
    %0 = vector.load %arg2[%c0, %c0_0] : memref<21x16xbf16, #tpu.memory_space<vmem>>, vector<21x16xbf16>
    %c0_1 = arith.constant 0 : index
    %c0_2 = arith.constant 0 : index
    %1 = vector.load %arg1[%c0_1, %c0_2] : memref<16x512xbf16, #tpu.memory_space<vmem>>, vector<16x512xbf16>
    %cst = arith.constant dense<0.000000e+00> : vector<21x512xf32>
    %2 = tpu.matmul %0, %1, %cst {dimension_numbers = #tpu.dot_dimension_numbers<[1], [0], [0], [1], [0, 0, 1, 1], [], []>} : vector<21x16xbf16>, vector<16x512xbf16>, vector<21x512xf32> -> vector<21x512xf32>
    %c0_3 = arith.constant 0 : index
    %c0_4 = arith.constant 0 : index
    %3 = vector.load %arg4[%c0_3, %c0_4] : memref<21x16xbf16, #tpu.memory_space<vmem>>, vector<21x16xbf16>
    %c0_5 = arith.constant 0 : index
    %c0_6 = arith.constant 0 : index
    %4 = vector.load %arg3[%c0_5, %c0_6] : memref<16x512xbf16, #tpu.memory_space<vmem>>, vector<16x512xbf16>
    %cst_7 = arith.constant dense<0.000000e+00> : vector<21x512xf32>
    %5 = tpu.matmul %3, %4, %cst_7 {dimension_numbers = #tpu.dot_dimension_numbers<[1], [0], [0], [1], [0, 0, 1, 1], [], []>} : vector<21x16xbf16>, vector<16x512xbf16>, vector<21x512xf32> -> vector<21x512xf32>
    %6 = arith.addf %2, %5 : vector<21x512xf32>
    %c0_8 = arith.constant 0 : index
    %c0_9 = arith.constant 0 : index
    %7 = vector.load %arg5[%c0_8, %c0_9] : memref<21x1xf32, #tpu.memory_space<vmem>>, vector<21x1xf32>
    %8 = vector.broadcast %7 : vector<21x1xf32> to vector<21x512xf32>
    %9 = arith.addf %6, %8 : vector<21x512xf32>
    %c0_10 = arith.constant 0 : index
    %c0_11 = arith.constant 0 : index
    %10 = vector.load %arg6[%c0_10, %c0_11] : memref<21x1xf32, #tpu.memory_space<vmem>>, vector<21x1xf32>
    %cst_12 = arith.constant 0.000000e+00 : f32
    %11 = vector.broadcast %cst_12 : f32 to vector<21x1xf32>
    %12 = arith.cmpf ogt, %10, %11 : vector<21x1xf32>
    %cst_13 = arith.constant 0.000000e+00 : f32
    %13 = vector.shape_cast %12 : vector<21x1xi1> to vector<21x1xi1>
    %14 = vector.broadcast %13 : vector<21x1xi1> to vector<21x512xi1>
    %15 = vector.broadcast %cst_13 : f32 to vector<21x512xf32>
    %16 = arith.select %14, %9, %15 : vector<21x512xi1>, vector<21x512xf32>
    %17 = math.exp %16 : vector<21x512xf32>
    %18 = arith.negf %9 : vector<21x512xf32>
    %19 = math.exp %18 : vector<21x512xf32>
    %cst_14 = arith.constant 1.000000e+00 : f32
    %20 = vector.broadcast %cst_14 : f32 to vector<21x512xf32>
    %21 = arith.addf %20, %19 : vector<21x512xf32>
    %22 = arith.divf %20, %21 : vector<21x512xf32>
    %c0_15 = arith.constant 0 : index
    %c0_16 = arith.constant 0 : index
    %23 = vector.load %arg8[%c0_15, %c0_16] : memref<21x512xf32, #tpu.memory_space<vmem>>, vector<21x512xf32>
    %24 = arith.addf %22, %23 : vector<21x512xf32>
    %25 = vector.shape_cast %12 : vector<21x1xi1> to vector<21x1xi1>
    %26 = vector.broadcast %25 : vector<21x1xi1> to vector<21x512xi1>
    %27 = arith.select %26, %17, %24 : vector<21x512xi1>, vector<21x512xf32>
    %c0_17 = arith.constant 0 : index
    %c0_18 = arith.constant 0 : index
    %28 = vector.load %arg7[%c0_17, %c0_18] : memref<21x1xf32, #tpu.memory_space<vmem>>, vector<21x1xf32>
    %29 = vector.broadcast %28 : vector<21x1xf32> to vector<21x512xf32>
    %30 = arith.mulf %27, %29 : vector<21x512xf32>
    %c0_19 = arith.constant 0 : index
    %c0_20 = arith.constant 0 : index
    %31 = vector.load %arg9[%c0_19, %c0_20] : memref<21x512xf32, #tpu.memory_space<vmem>>, vector<21x512xf32>
    tpu.vector_store %arg9[%c0_19, %c0_20], %30 {strides = array<i32>} : memref<21x512xf32, #tpu.memory_space<vmem>>, vector<21x512xf32>,
    return
  }
  func.func @transform_0(%arg0: i32) -> (i32, i32) {
    %c0_i32 = arith.constant 0 : i32
    %c0_i32_0 = arith.constant 0 : i32
    %c0_i32_1 = arith.constant 0 : i32
    return %c0_i32, %c0_i32_0 : i32, i32
  }
  func.func @transform_1(%arg0: i32) -> (i32, i32) {
    %c0_i32 = arith.constant 0 : i32
    %c0_i32_0 = arith.constant 0 : i32
    %c0_i32_1 = arith.constant 0 : i32
    return %c0_i32, %c0_i32_0 : i32, i32
  }
  func.func @transform_2(%arg0: i32) -> (i32, i32) {
    %c0_i32 = arith.constant 0 : i32
    %c0_i32_0 = arith.constant 0 : i32
    %c0_i32_1 = arith.constant 0 : i32
    return %c0_i32, %c0_i32_0 : i32, i32
  }
  func.func @transform_3(%arg0: i32) -> (i32, i32) {
    %c0_i32 = arith.constant 0 : i32
    %c0_i32_0 = arith.constant 0 : i32
    %c0_i32_1 = arith.constant 0 : i32
    return %c0_i32, %c0_i32_0 : i32, i32
  }
  func.func @transform_4(%arg0: i32) -> (i32, i32) {
    %c0_i32 = arith.constant 0 : i32
    %c0_i32_0 = arith.constant 0 : i32
    %c0_i32_1 = arith.constant 0 : i32
    return %c0_i32, %c0_i32_0 : i32, i32
  }
  func.func @transform_5(%arg0: i32) -> (i32, i32) {
    %c0_i32 = arith.constant 0 : i32
    %c0_i32_0 = arith.constant 0 : i32
    %c0_i32_1 = arith.constant 0 : i32
    return %c0_i32, %c0_i32_0 : i32, i32
  }
  func.func @transform_6(%arg0: i32) -> (i32, i32) {
    %c0_i32 = arith.constant 0 : i32
    %c0_i32_0 = arith.constant 0 : i32
    %c0_i32_1 = arith.constant 0 : i32
    return %c0_i32, %c0_i32_0 : i32, i32
  }
  func.func @transform_7(%arg0: i32) -> (i32, i32) {
    %c0_i32 = arith.constant 0 : i32
    %c0_i32_0 = arith.constant 0 : i32
    %c0_i32_1 = arith.constant 0 : i32
    return %c0_i32, %c0_i32_0 : i32, i32
  }
  func.func @transform_8(%arg0: i32) -> (i32, i32) {
    %c0_i32 = arith.constant 0 : i32
    %c0_i32_0 = arith.constant 0 : i32
    %c0_i32_1 = arith.constant 0 : i32
    return %c0_i32, %c0_i32_0 : i32, i32
  }
}

module attributes {stable_mosaic.version = 11 : i64} {
  func.func @kernel(%arg0: i32, %arg1: memref<16x128xbf16, #tpu.memory_space<vmem>>, %arg2: memref<21x16xbf16, #tpu.memory_space<vmem>>, %arg3: memref<21x1xf32, #tpu.memory_space<vmem>>, %arg4: memref<21x1xf32, #tpu.memory_space<vmem>>, %arg5: memref<21x1xf32, #tpu.memory_space<vmem>>, %arg6: memref<21x128xf32, #tpu.memory_space<vmem>>, %arg7: memref<21x128xf32, #tpu.memory_space<vmem>>) attributes {dimension_semantics = [#tpu.dimension_semantics<arbitrary>], iteration_bounds = array<i64: 1>, scalar_prefetch = 0 : i64, scratch_operands = 0 : i64, tpu.core_type = #tpu.core_type<tc>, window_params = [{pipeline_mode = #tpu.pipeline_mode<synchronous>, transform_indices = @transform_0, window_bounds = array<i64: 16, 128>}, {pipeline_mode = #tpu.pipeline_mode<synchronous>, transform_indices = @transform_1, window_bounds = array<i64: 21, 16>}, {pipeline_mode = #tpu.pipeline_mode<synchronous>, transform_indices = @transform_2, window_bounds = array<i64: 21, 1>}, {pipeline_mode = #tpu.pipeline_mode<synchronous>, transform_indices = @transform_3, window_bounds = array<i64: 21, 1>}, {pipeline_mode = #tpu.pipeline_mode<synchronous>, transform_indices = @transform_4, window_bounds = array<i64: 21, 1>}, {pipeline_mode = #tpu.pipeline_mode<synchronous>, transform_indices = @transform_5, window_bounds = array<i64: 21, 128>}, {pipeline_mode = #tpu.pipeline_mode<synchronous>, transform_indices = @transform_6, window_bounds = array<i64: 21, 128>}]} {
    %c0 = arith.constant 0 : index
    %c0_0 = arith.constant 0 : index
    %0 = vector.load %arg2[%c0, %c0_0] : memref<21x16xbf16, #tpu.memory_space<vmem>>, vector<21x16xbf16>
    %c0_1 = arith.constant 0 : index
    %c0_2 = arith.constant 0 : index
    %1 = vector.load %arg1[%c0_1, %c0_2] : memref<16x128xbf16, #tpu.memory_space<vmem>>, vector<16x128xbf16>
    %cst = arith.constant dense<0.000000e+00> : vector<21x128xf32>
    %2 = tpu.matmul %0, %1, %cst {dimension_numbers = #tpu.dot_dimension_numbers<[1], [0], [0], [1], [0, 0, 1, 1], [], []>} : vector<21x16xbf16>, vector<16x128xbf16>, vector<21x128xf32> -> vector<21x128xf32>
    %c0_3 = arith.constant 0 : index
    %c0_4 = arith.constant 0 : index
    %3 = vector.load %arg3[%c0_3, %c0_4] : memref<21x1xf32, #tpu.memory_space<vmem>>, vector<21x1xf32>
    %4 = vector.broadcast %3 : vector<21x1xf32> to vector<21x128xf32>
    %5 = arith.addf %2, %4 : vector<21x128xf32>
    %c0_5 = arith.constant 0 : index
    %c0_6 = arith.constant 0 : index
    %6 = vector.load %arg4[%c0_5, %c0_6] : memref<21x1xf32, #tpu.memory_space<vmem>>, vector<21x1xf32>
    %cst_7 = arith.constant 0.000000e+00 : f32
    %7 = vector.broadcast %cst_7 : f32 to vector<21x1xf32>
    %8 = arith.cmpf ogt, %6, %7 : vector<21x1xf32>
    %cst_8 = arith.constant 0.000000e+00 : f32
    %9 = vector.shape_cast %8 : vector<21x1xi1> to vector<21x1xi1>
    %10 = vector.broadcast %9 : vector<21x1xi1> to vector<21x128xi1>
    %11 = vector.broadcast %cst_8 : f32 to vector<21x128xf32>
    %12 = arith.select %10, %5, %11 : vector<21x128xi1>, vector<21x128xf32>
    %13 = math.exp %12 : vector<21x128xf32>
    %14 = arith.negf %5 : vector<21x128xf32>
    %15 = math.exp %14 : vector<21x128xf32>
    %cst_9 = arith.constant 1.000000e+00 : f32
    %16 = vector.broadcast %cst_9 : f32 to vector<21x128xf32>
    %17 = arith.addf %16, %15 : vector<21x128xf32>
    %18 = arith.divf %16, %17 : vector<21x128xf32>
    %c0_10 = arith.constant 0 : index
    %c0_11 = arith.constant 0 : index
    %19 = vector.load %arg6[%c0_10, %c0_11] : memref<21x128xf32, #tpu.memory_space<vmem>>, vector<21x128xf32>
    %20 = arith.addf %18, %19 : vector<21x128xf32>
    %21 = vector.shape_cast %8 : vector<21x1xi1> to vector<21x1xi1>
    %22 = vector.broadcast %21 : vector<21x1xi1> to vector<21x128xi1>
    %23 = arith.select %22, %13, %20 : vector<21x128xi1>, vector<21x128xf32>
    %c0_12 = arith.constant 0 : index
    %c0_13 = arith.constant 0 : index
    %24 = vector.load %arg5[%c0_12, %c0_13] : memref<21x1xf32, #tpu.memory_space<vmem>>, vector<21x1xf32>
    %25 = vector.broadcast %24 : vector<21x1xf32> to vector<21x128xf32>
    %26 = arith.mulf %23, %25 : vector<21x128xf32>
    %c0_14 = arith.constant 0 : index
    %c0_15 = arith.constant 0 : index
    %27 = vector.load %arg7[%c0_14, %c0_15] : memref<21x128xf32, #tpu.memory_space<vmem>>, vector<21x128xf32>
    tpu.vector_store %arg7[%c0_14, %c0_15], %26 {strides = array<i32>} : memref<21x128xf32, #tpu.memory_space<vmem>>, vector<21x128xf32>,
    return
  }
  func.func @transform_0(%arg0: i32) -> (i32, i32) {
    %c0_i32 = arith.constant 0 : i32
    %c0_i32_0 = arith.constant 0 : i32
    %c0_i32_1 = arith.constant 0 : i32
    return %c0_i32, %c0_i32_0 : i32, i32
  }
  func.func @transform_1(%arg0: i32) -> (i32, i32) {
    %c0_i32 = arith.constant 0 : i32
    %c0_i32_0 = arith.constant 0 : i32
    %c0_i32_1 = arith.constant 0 : i32
    return %c0_i32, %c0_i32_0 : i32, i32
  }
  func.func @transform_2(%arg0: i32) -> (i32, i32) {
    %c0_i32 = arith.constant 0 : i32
    %c0_i32_0 = arith.constant 0 : i32
    %c0_i32_1 = arith.constant 0 : i32
    return %c0_i32, %c0_i32_0 : i32, i32
  }
  func.func @transform_3(%arg0: i32) -> (i32, i32) {
    %c0_i32 = arith.constant 0 : i32
    %c0_i32_0 = arith.constant 0 : i32
    %c0_i32_1 = arith.constant 0 : i32
    return %c0_i32, %c0_i32_0 : i32, i32
  }
  func.func @transform_4(%arg0: i32) -> (i32, i32) {
    %c0_i32 = arith.constant 0 : i32
    %c0_i32_0 = arith.constant 0 : i32
    %c0_i32_1 = arith.constant 0 : i32
    return %c0_i32, %c0_i32_0 : i32, i32
  }
  func.func @transform_5(%arg0: i32) -> (i32, i32) {
    %c0_i32 = arith.constant 0 : i32
    %c0_i32_0 = arith.constant 0 : i32
    %c0_i32_1 = arith.constant 0 : i32
    return %c0_i32, %c0_i32_0 : i32, i32
  }
  func.func @transform_6(%arg0: i32) -> (i32, i32) {
    %c0_i32 = arith.constant 0 : i32
    %c0_i32_0 = arith.constant 0 : i32
    %c0_i32_1 = arith.constant 0 : i32
    return %c0_i32, %c0_i32_0 : i32, i32
  }
}

</mosaic_0001>

<bundles_post_ra>
// kernel: _forward.7
= control target key start
LH: loop header
LB: loop body
LE: loop exit
PB: predicated region body
PF: predicated region fallthrough
CT: control target
= control target key end

     0   :  { %v214_v1 = vmov 0   ;;  %vm70_vm0 = vcmask 261120   ;;  %s271_s0 = inlined_call_operand.vmem [shape: bf16[32,512], index: 0, kind: input, shape index: {}]   ;;  %s272_s2 = inlined_call_operand.vmem [shape: f32[8,1], index: 2, kind: input, shape index: {}]   ;;  %s273_s1 = inlined_call_operand.vmem [shape: bf16[8,32], index: 1, kind: input, shape index: {}]   ;;  %s274_s3 = inlined_call_operand.vmem [shape: bf16[8,512], index: 3, kind: output, shape index: {}]  }
   0x1   :  { %v202_v0 = vld [vmem:[%s271_s0 + $0x4] ss:$16 sps:$4 sm:$0xff]   ;;  %106 = vmatprep.mubr.bf16.mxu0 %v214_v1  ;;  %147 = vmatprep.mubr.bf16.mxu1 %v214_v1  ;;  %v204_v2 = vld [vmem:[%s271_s0 + $0xc] ss:$16 sps:$4 sm:$0xff]   ;;  %v206_v3 = vld [vmem:[%s271_s0] ss:$16 sps:$4 sm:$0xff]  }
   0x2   :  { %201 = vset.pattern.permute.xlu0 %v214_v1  ;;  %74 = vmatprep.subr.bf16.mxu0 %v202_v0  ;;  %v207_v4 = vld [vmem:[%s271_s0 + $0x8] ss:$16 sps:$4 sm:$0xff]   ;;  %v208_v5 = vld [vmem:[%s271_s0 + $0x24] ss:$16 sps:$4 sm:$0xff]   ;;  %v210_v6 = vld [vmem:[%s271_s0 + $0x2c] ss:$16 sps:$4 sm:$0xff]  }
   0x3   :  { %115 = vmatprep.subr.bf16.mxu1 %v204_v2  ;;  %75 = vmatpush1.bf16.msra.mxu0 %v206_v3  ;;  %v212_v7 = vld [vmem:[%s271_s0 + $0x20] ss:$16 sps:$4 sm:$0xff]   ;;  %v213_v8 = vld [vmem:[%s271_s0 + $0x28] ss:$16 sps:$4 sm:$0xff]  }
   0x4   :  { %116 = vmatpush1.bf16.msra.mxu1 %v207_v4  ;;  %76 = vmatprep.subr.bf16.mxu0 %v208_v5  ;;  %v24_v9 = vld [vmem:[%s272_s2] sm:$0xff] }
   0x5   :  { %117 = vmatprep.subr.bf16.mxu1 %v210_v6  ;;  %27 = vperm.xlu0 %201, %v24_v9   ;;  %v15_v10 = vld [vmem:[%s273_s1] sm:$0xf] }
   0x7   :  { %77 = vmatpush1.bf16.msra.mxu0 %v212_v7 }
   0x8   :  { %118 = vmatpush1.bf16.msra.mxu1 %v213_v8 }
   0xa   :  { %194 = vmatmul.mubr.msk.bf16.vlgmr.msra.gmra.mrb[0].mxu0 %vm70_vm0, %v15_v10 }
   0xb   :  { %195 = vmatmul.mubr.msk.bf16.vlgmr.msra.gmra.mrb[0].mxu1 %vm70_vm0, %v15_v10 }
  0x84   :  { %v28_v11 = vpop.permute.xlu0 %27 }
  0xdd   :  { %v108_v12 = vpop.f32.mrb[0].mxu0 }
  0xde   :  { %v149_v13 = vpop.f32.mrb[0].mxu1  ;;  %v109_v14 = vadd.f32 %v108_v12, %v28_v11  ;;  %v110_v16 = vpop.f32.mrb[1].mxu0 }
  0xdf   :  { %v150_v15 = vadd.f32 %v149_v13, %v28_v11  ;;  %v151_v17 = vpop.f32.mrb[1].mxu1  ;;  %v111_v18 = vadd.f32 %v110_v16, %v28_v11  ;;  %v112_v20 = vpop.f32.mrb[2].mxu0 }
  0xe0   :  { %v152_v19 = vadd.f32 %v151_v17, %v28_v11  ;;  %v153_v21 = vpop.f32.mrb[2].mxu1  ;;  %v156_v22 = vmul.f32 0.1, %v109_v14  ;;  %v113_v24 = vpop.f32.mrb[3].mxu0 }
  0xe1   :  { %v158_v23 = vmul.f32 0.1, %v150_v15  ;;  %v154_v25 = vpop.f32.mrb[3].mxu1  ;;  %v157_v26 = vmul.f32 0.1, %v111_v18 }
  0xe2   :  { %v159_v27 = vmul.f32 0.1, %v152_v19  ;;  %v160_v28 = vmax.f32 %v109_v14, %v156_v22 }
  0xe3   :  { %v162_v29 = vmax.f32 %v150_v15, %v158_v23  ;;  %v161_v30 = vmax.f32 %v111_v18, %v157_v26 }
  0xe4   :  { %v163_v31 = vmax.f32 %v152_v19, %v159_v27 }
  0xe5   :  { %v198_v32 = vpack.c.bf16 %v161_v30, %v160_v28 }
  0xe6   :  { %v199_v33 = vpack.c.bf16 %v163_v31, %v162_v29 }
  0xe7   :  { %180 = vst [vmem:[%s274_s3] sm:$0xff] %v198_v32 }
  0xe8   :  { %181 = vst [vmem:[%s274_s3 + $0x8] sm:$0xff] %v199_v33 }

// kernel: _forward.9
= control target key start
LH: loop header
LB: loop body
LE: loop exit
PB: predicated region body
PF: predicated region fallthrough
CT: control target
= control target key end

     0   :  { %v97_v0 = vmov 0.0   ;;  %vm98_vm0 = vmmov 0   ;;  %v99_v2 = vmov 0   ;;  %vm30_vm1 = vcmask 130048   ;;  %s132_s0 = inlined_call_operand.vmem [shape: bf16[16,128], index: 0, kind: input, shape index: {}]   ;;  %s133_s1 = inlined_call_operand.vmem [shape: bf16[8,16], index: 1, kind: input, shape index: {}]   ;;  %s134_s2 = inlined_call_operand.vmem [shape: f32[8,1], index: 2, kind: input, shape index: {}]   ;;  %s135_s3 = inlined_call_operand.vmem [shape: bf16[8,128], index: 3, kind: output, shape index: {}]  }
   0x1   :  { %86 = vmatprep.subr.bf16.mxu0 %v97_v0  ;;  %v96_v1 = vld [vmem:[%s132_s0] sm:$0xff]   ;;  %88 = vmatprep.mubr.msk.bf16.mxu0 %vm98_vm0, %v97_v0 }
   0x2   :  { %95 = vset.pattern.permute.xlu0 %v99_v2  ;;  %v18_v3 = vld [vmem:[%s134_s2] sm:$0xff]  ;;  %87 = vmatpush3.bf16.msra.mxu0 %v96_v1 }
   0x3   :  { %v15_v4 = vld [vmem:[%s133_s1] sm:$0xf]  ;;  %21 = vperm.xlu0 %95, %v18_v3  }
   0x5   :  { %89 = vmatmul.mubr.msk.bf16.vlgmr.msra.gmra.mrb[0].mxu0 %vm30_vm1, %v15_v4 }
  0x82   :  { %v22_v5 = vpop.permute.xlu0 %21 }
  0xd8   :  { %v68_v6 = vpop.f32.mrb[0].mxu0 }
  0xd9   :  { %v69_v7 = vadd.f32 %v68_v6, %v22_v5  ;;  %v90_v8 = vpop.f32.mrb[1].mxu0 }
  0xda   :  { %v71_v9 = vpop.f32.mrb[2].mxu0 }
  0xdb   :  { %v74_v10 = vmul.f32 0.1, %v69_v7  ;;  %v91_v11 = vpop.f32.mrb[3].mxu0 }
  0xdd   :  { %v75_v12 = vmax.f32 %v69_v7, %v74_v10 }
  0xdf   :  { %v76_v13 = vpack.c.bf16 %v75_v12, %v75_v12 }
  0xe1   :  { %77 = vst [vmem:[%s135_s3] sm:$0xf] %v76_v13 }

// kernel: _forward.8
= control target key start
LH: loop header
LB: loop body
LE: loop exit
PB: predicated region body
PF: predicated region fallthrough
CT: control target
= control target key end

     0   :  { %v183_v0 = vmov 0.0   ;;  %vm184_vm0 = vmmov 0   ;;  %v185_v2 = vmov 0   ;;  %vm74_vm1 = vcmask 654336   ;;  %s233_s0 = inlined_call_operand.vmem [shape: bf16[80,128], index: 0, kind: input, shape index: {}]   ;;  %s234_s2 = inlined_call_operand.vmem [shape: f32[16,1], index: 2, kind: input, shape index: {}]   ;;  %s235_s1 = inlined_call_operand.vmem [shape: bf16[16,80], index: 1, kind: input, shape index: {}]   ;;  %s236_s3 = inlined_call_operand.vmem [shape: bf16[16,128], index: 3, kind: output, shape index: {}]  }
   0x1   :  { %159 = vmatprep.subr.bf16.mxu0 %v183_v0  ;;  %v177_v1 = vld [vmem:[%s233_s0] sm:$0xff]   ;;  %169 = vmatprep.mubr.msk.bf16.mxu0 %vm184_vm0, %v183_v0  ;;  %v178_v3 = vld [vmem:[%s233_s0 + $0x8] sm:$0xff]   ;;  %v179_v4 = vld [vmem:[%s233_s0 + $0x10] sm:$0xff]  }
   0x2   :  { %176 = vset.pattern.permute.xlu0 %v185_v2  ;;  %160 = vmatpush3.bf16.msra.mxu0 %v177_v1  ;;  %v27_v5 = vld [vmem:[%s234_s2] sm:$0xff]  ;;  %v28_v6 = vld [vmem:[%s234_s2 + $0x8] sm:$0xff]  ;;  %v180_v7 = vld [vmem:[%s233_s0 + $0x18] sm:$0xff]  }
   0x3   :  { %161 = vmatprep.subr.bf16.mxu0 %v183_v0  ;;  %31 = vperm.xlu0 %176, %v27_v5   ;;  %v181_v8 = vld [vmem:[%s233_s0 + $0x20] sm:$0xff]  }
   0x4   :  { %v182_v9 = vld [vmem:[%s235_s1] sm:$0xff]  }
   0x6   :  { %162 = vmatpush3.bf16.msra.mxu0 %v178_v3 }
   0x7   :  { %163 = vmatprep.subr.bf16.mxu0 %v183_v0  ;;  %36 = vperm.xlu0 %176, %v28_v6  }
   0xa   :  { %164 = vmatpush3.bf16.msra.mxu0 %v179_v4 }
   0xb   :  { %165 = vmatprep.subr.bf16.mxu0 %v183_v0 }
   0xe   :  { %166 = vmatpush3.bf16.msra.mxu0 %v180_v7 }
   0xf   :  { %167 = vmatprep.subr.bf16.mxu0 %v183_v0 }
  0x12   :  { %168 = vmatpush3.bf16.msra.mxu0 %v181_v8 }
  0x15   :  { %170 = vmatmul.mubr.msk.bf16.vlgmr.msra.gmra.mrb[0].mxu0 %vm74_vm1, %v182_v9 }
  0x82   :  { %v32_v10 = vpop.permute.xlu0 %31 }
  0x86   :  { %v37_v14 = vpop.permute.xlu0 %36 }
  0xe8   :  { %v112_v11 = vpop.f32.mrb[0].mxu0 }
  0xe9   :  { %v113_v12 = vadd.f32 %v112_v11, %v32_v10  ;;  %v171_v13 = vpop.f32.mrb[1].mxu0 }
  0xea   :  { %v115_v15 = vpop.f32.mrb[2].mxu0 }
  0xeb   :  { %v119_v16 = vmul.f32 0.1, %v113_v12  ;;  %v116_v17 = vadd.f32 %v115_v15, %v37_v14  ;;  %v172_v18 = vpop.f32.mrb[3].mxu0 }
  0xed   :  { %v120_v19 = vmul.f32 0.1, %v116_v17  ;;  %v121_v20 = vmax.f32 %v113_v12, %v119_v16 }
  0xef   :  { %v122_v21 = vmax.f32 %v116_v17, %v120_v19 }
  0xf1   :  { %v151_v22 = vpack.c.bf16 %v122_v21, %v121_v20 }
  0xf3   :  { %152 = vst [vmem:[%s236_s3] sm:$0xff] %v151_v22  }

// kernel: _forward.10
= control target key start
LH: loop header
LB: loop body
LE: loop exit
PB: predicated region body
PF: predicated region fallthrough
CT: control target
= control target key end

     0   :  { %v196_v0 = vmov 0.0   ;;  %vm197_vm0 = vmmov 0   ;;  %v198_v2 = vmov 0   ;;  %vm77_vm1 = vcmask 654336   ;;  %s254_s0 = inlined_call_operand.vmem [shape: bf16[80,128], index: 0, kind: input, shape index: {}]   ;;  %s255_s2 = inlined_call_operand.vmem [shape: f32[16,1], index: 2, kind: input, shape index: {}]   ;;  %s256_s1 = inlined_call_operand.vmem [shape: bf16[16,80], index: 1, kind: input, shape index: {}]   ;;  %s257_s3 = inlined_call_operand.vmem [shape: bf16[16,128], index: 3, kind: input, shape index: {}]   ;;  %s258_s4 = inlined_call_operand.vmem [shape: bf16[16,128], index: 4, kind: output, shape index: {}]  }
   0x1   :  { %172 = vmatprep.subr.bf16.mxu0 %v196_v0  ;;  %v190_v1 = vld [vmem:[%s254_s0] sm:$0xff]   ;;  %182 = vmatprep.mubr.msk.bf16.mxu0 %vm197_vm0, %v196_v0  ;;  %v191_v3 = vld [vmem:[%s254_s0 + $0x8] sm:$0xff]   ;;  %v192_v4 = vld [vmem:[%s254_s0 + $0x10] sm:$0xff]  }
   0x2   :  { %189 = vset.pattern.permute.xlu0 %v198_v2  ;;  %173 = vmatpush3.bf16.msra.mxu0 %v190_v1  ;;  %v30_v5 = vld [vmem:[%s255_s2] sm:$0xff]  ;;  %v31_v6 = vld [vmem:[%s255_s2 + $0x8] sm:$0xff]  ;;  %v193_v7 = vld [vmem:[%s254_s0 + $0x18] sm:$0xff]  }
   0x3   :  { %174 = vmatprep.subr.bf16.mxu0 %v196_v0  ;;  %34 = vperm.xlu0 %189, %v30_v5   ;;  %v194_v8 = vld [vmem:[%s254_s0 + $0x20] sm:$0xff]  }
   0x4   :  { %v195_v9 = vld [vmem:[%s256_s1] sm:$0xff]  }
   0x5   :  { %v158_v15 = vld [vmem:[%s257_s3] sm:$0xff]  }
   0x6   :  { %175 = vmatpush3.bf16.msra.mxu0 %v191_v3  ;;  %v159_v21 = vunpack.c.l.bf16 %v158_v15  ;;  %v160_v23 = vunpack.c.h.bf16 %v158_v15 }
   0x7   :  { %176 = vmatprep.subr.bf16.mxu0 %v196_v0  ;;  %39 = vperm.xlu0 %189, %v31_v6  }
   0xa   :  { %177 = vmatpush3.bf16.msra.mxu0 %v192_v4 }
   0xb   :  { %178 = vmatprep.subr.bf16.mxu0 %v196_v0 }
   0xe   :  { %179 = vmatpush3.bf16.msra.mxu0 %v193_v7 }
   0xf   :  { %180 = vmatprep.subr.bf16.mxu0 %v196_v0 }
  0x12   :  { %181 = vmatpush3.bf16.msra.mxu0 %v194_v8 }
  0x15   :  { %183 = vmatmul.mubr.msk.bf16.vlgmr.msra.gmra.mrb[0].mxu0 %vm77_vm1, %v195_v9 }
  0x82   :  { %v35_v10 = vpop.permute.xlu0 %34 }
  0x86   :  { %v40_v14 = vpop.permute.xlu0 %39 }
  0xe8   :  { %v115_v11 = vpop.f32.mrb[0].mxu0 }
  0xe9   :  { %v116_v12 = vadd.f32 %v115_v11, %v35_v10  ;;  %v184_v13 = vpop.f32.mrb[1].mxu0 }
  0xea   :  { %v118_v16 = vpop.f32.mrb[2].mxu0 }
  0xeb   :  { %v122_v17 = vmul.f32 0.1, %v116_v12  ;;  %v119_v18 = vadd.f32 %v118_v16, %v40_v14  ;;  %v185_v19 = vpop.f32.mrb[3].mxu0 }
  0xed   :  { %v124_v20 = vmax.f32 %v116_v12, %v122_v17  ;;  %v123_v22 = vmul.f32 0.1, %v119_v18 }
  0xef   :  { %v125_v24 = vmax.f32 %v119_v18, %v123_v22  ;;  %v130_v25 = vadd.f32 %v159_v21, %v124_v20 }
  0xf1   :  { %v131_v26 = vadd.f32 %v160_v23, %v125_v24 }
  0xf3   :  { %v164_v27 = vpack.c.bf16 %v131_v26, %v130_v25 }
  0xf5   :  { %165 = vst [vmem:[%s258_s4] sm:$0xff] %v164_v27  }

// kernel: _forward.13
= control target key start
LH: loop header
LB: loop body
LE: loop exit
PB: predicated region body
PF: predicated region fallthrough
CT: control target
= control target key end

     0   :  { %v689_v1 = vmov 0   ;;  %vm72_vm0 = vcmask 130048   ;;  %s957_s2 = inlined_call_operand.vmem [shape: bf16[16,512], index: 2, kind: input, shape index: {}]   ;;  %s958_s3 = inlined_call_operand.vmem [shape: bf16[21,16], index: 3, kind: input, shape index: {}]   ;;  %s959_s0 = inlined_call_operand.vmem [shape: bf16[16,512], index: 0, kind: input, shape index: {}]   ;;  %s960_s1 = inlined_call_operand.vmem [shape: bf16[21,16], index: 1, kind: input, shape index: {}]   ;;  %s961_s4 = inlined_call_operand.vmem [shape: f32[21,1], index: 4, kind: input, shape index: {}]   ;;  %s962_s5 = inlined_call_operand.vmem [shape: f32[21,1], index: 5, kind: input, shape index: {}]   ;;  %s963_s6 = inlined_call_operand.vmem [shape: f32[21,1], index: 6, kind: input, shape index: {}]   ;;  %s964_s7 = inlined_call_operand.vmem [shape: f32[21,512], index: 7, kind: input, shape index: {}]   ;;  %s965_s8 = inlined_call_operand.vmem [shape: f32[21,512], index: 8, kind: output, shape index: {}]  }
   0x1   :  { %v601_v0 = vld [vmem:[%s957_s2 + $0x4] ss:$16 sps:$4 sm:$0xff]   ;;  %111 = vmatprep.mubr.bf16.mxu0 %v689_v1  ;;  %162 = vmatprep.mubr.bf16.mxu1 %v689_v1  ;;  %v603_v2 = vld [vmem:[%s957_s2 + $0xc] ss:$16 sps:$4 sm:$0xff]   ;;  %v605_v3 = vld [vmem:[%s957_s2] ss:$16 sps:$4 sm:$0xff]  }
   0x2   :  { %599 = vset.pattern.permute.xlu0 %v689_v1  ;;  %600 = vset.pattern.permute.xlu1 %v689_v1  ;;  %v606_v4 = vld [vmem:[%s957_s2 + $0x8] ss:$16 sps:$4 sm:$0xff]   ;;  %v607_v5 = vld [vmem:[%s958_s3] sm:$0xff]   ;;  %v613_v9 = vld [vmem:[%s959_s0 + $0xc] ss:$16 sps:$4 sm:$0xff]  }
   0x3   :  { %79 = vmatprep.subr.bf16.mxu0 %v601_v0  ;;  %130 = vmatprep.subr.bf16.mxu1 %v603_v2  ;;  %v608_v6 = vld [vmem:[%s959_s0] ss:$16 sps:$4 sm:$0xff]   ;;  %v610_v7 = vld [vmem:[%s959_s0 + $0x4] ss:$16 sps:$4 sm:$0xff]   ;;  %v611_v8 = vld [vmem:[%s959_s0 + $0x8] ss:$16 sps:$4 sm:$0xff]  }
   0x4   :  { %80 = vmatpush1.bf16.msra.mxu0 %v605_v3  ;;  %131 = vmatpush1.bf16.msra.mxu1 %v606_v4  ;;  %v317_v10 = vld [vmem:[%s961_s4] sm:$0xff]  ;;  %v319_v11 = vld [vmem:[%s961_s4 + $0x10] sm:$0x1f]  ;;  %v348_v12 = vld [vmem:[%s962_s5 + $0x8] sm:$0xff] }
   0x5   :  { %215 = vmatprep.subr.bf16.mxu0 %v610_v7  ;;  %266 = vmatprep.subr.bf16.mxu1 %v613_v9  ;;  %v347_v13 = vld [vmem:[%s962_s5] sm:$0xff]  ;;  %v614_v14 = vld [vmem:[%s958_s3 + $0x8] ss:$0 sps:$4 sm:$0x77]   ;;  %vm351_vm2 = vcmp.gt.f32.partialorder %v348_v12, 0.0 }
   0x6   :  { %322 = vperm.xlu0 %599, %v317_v10   ;;  %v318_v15 = vld [vmem:[%s961_s4 + $0x8] sm:$0xff]  ;;  %332 = vperm.xlu1 %600, %v319_v11   ;;  %vm350_vm1 = vcmp.gt.f32.partialorder %v347_v13, 0.0  ;;  %v349_v16 = vld [vmem:[%s962_s5 + $0x10] sm:$0x1f]  ;;  %v354_v18 = vsel %vm351_vm2, 1, %v689_v1  ;;  %v615_v20 = vld [vmem:[%s960_s1] sm:$0xff]  }
   0x7   :  { %564 = vmatmul.mubr.msk.bf16.vlgmr.msra.gmra.mrb[0].mxu0 %vm72_vm0, %v607_v5  ;;  %566 = vmatmul.mubr.msk.bf16.vlgmr.msra.gmra.mrb[0].mxu1 %vm72_vm0, %v607_v5  ;;  %v353_v17 = vsel %vm350_vm1, 1, %v689_v1  ;;  %vm352_vm3 = vcmp.gt.f32.partialorder %v349_v16, 0.0  ;;  %v512_v21 = vld [vmem:[%s963_s6] sm:$0xff]  ;;  %v513_v22 = vld [vmem:[%s963_s6 + $0x8] sm:$0xff]  ;;  %v514_v23 = vld [vmem:[%s963_s6 + $0x10] sm:$0x1f] }
   0x8   :  { %216 = vmatpush1.bf16.msra.mxu0 %v608_v6  ;;  %267 = vmatpush1.bf16.msra.mxu1 %v611_v8  ;;  %v355_v19 = vsel %vm352_vm3, 1, %v689_v1  ;;  %v616_v24 = vld [vmem:[%s960_s1 + $0x8] ss:$0 sps:$4 sm:$0x77]  }
   0x9   :  { %121 = vmatprep.mubr.bf16.mxu0 %v689_v1  ;;  %172 = vmatprep.mubr.bf16.mxu1 %v689_v1 }
   0xa   :  { %327 = vperm.xlu0 %599, %v318_v15   ;;  %357 = vperm.xlu1 %600, %v353_v17  }
   0xe   :  { %360 = vperm.xlu0 %599, %v354_v18   ;;  %363 = vperm.xlu1 %600, %v355_v19  }
   0xf   :  { %565 = vmatmul.mubr.msk.bf16.gmra.mrb[4].mxu0 %vm72_vm0, %v614_v14  ;;  %567 = vmatmul.mubr.msk.bf16.gmra.mrb[4].mxu1 %vm72_vm0, %v614_v14 }
  0x10   :  { %247 = vmatprep.mubr.bf16.mxu0 %v689_v1  ;;  %298 = vmatprep.mubr.bf16.mxu1 %v689_v1 }
  0x12   :  { %517 = vperm.xlu0 %599, %v512_v21   ;;  %522 = vperm.xlu1 %600, %v513_v22  }
  0x16   :  { %527 = vperm.xlu0 %599, %v514_v23  }
  0x17   :  { %574 = vmatmul.mubr.msk.bf16.vlgmr.msra.gmra.mrb[0].mxu0 %vm72_vm0, %v615_v20  ;;  %576 = vmatmul.mubr.msk.bf16.vlgmr.msra.gmra.mrb[0].mxu1 %vm72_vm0, %v615_v20 }
  0x18   :  { %257 = vmatprep.mubr.bf16.mxu0 %v689_v1  ;;  %308 = vmatprep.mubr.bf16.mxu1 %v689_v1 }
  0x1f   :  { %575 = vmatmul.mubr.msk.bf16.gmra.mrb[8].mxu0 %vm72_vm0, %v616_v24  ;;  %577 = vmatmul.mubr.msk.bf16.gmra.mrb[8].mxu1 %vm72_vm0, %v616_v24 }
  0x85   :  { %v806_v25 = vpop.permute.xlu1 %332  ;;  %v323_v34 = vpop.permute.xlu0 %322 }
  0x89   :  { %v808_v35 = vpop.permute.xlu1 %357  ;;  %v328_v48 = vpop.permute.xlu0 %327 }
  0x8a   :  { %vm365_vm4 = vcmp.eq.s32.totalorder %v808_v35, 1 }
  0x8d   :  { %v817_v16 = vpop.permute.xlu0 %360 }
  0x8e   :  { %vm366_vm5 = vcmp.eq.s32.totalorder %v817_v16, 1 }
  0xe2   :  { %v123_v26 = vpop.f32.mrb[4].mxu0  ;;  %v174_v27 = vpop.f32.mrb[4].mxu1 }
  0xe3   :  { %v125_v28 = vpop.f32.mrb[5].mxu0  ;;  %v176_v29 = vpop.f32.mrb[5].mxu1 }
  0xe4   :  { %v127_v30 = vpop.f32.mrb[6].mxu0  ;;  %v178_v31 = vpop.f32.mrb[6].mxu1 }
  0xe5   :  { %v128_v32 = vpop.f32.mrb[7].mxu0  ;;  %v179_v33 = vpop.f32.mrb[7].mxu1 }
  0xea   :  { %v249_v36 = vpop.f32.mrb[0].mxu0  ;;  %v300_v37 = vpop.f32.mrb[0].mxu1 }
  0xeb   :  { %v335_v38 = vadd.f32 %v323_v34, %v249_v36  ;;  %v337_v39 = vadd.f32 %v323_v34, %v300_v37  ;;  %v251_v40 = vpop.f32.mrb[1].mxu0  ;;  %v302_v41 = vpop.f32.mrb[1].mxu1 }
  0xec   :  { %v336_v42 = vadd.f32 %v323_v34, %v251_v40  ;;  %v253_v43 = vpop.f32.mrb[2].mxu0  ;;  %v304_v44 = vpop.f32.mrb[2].mxu1  ;;  %v338_v47 = vadd.f32 %v323_v34, %v302_v41 }
  0xed   :  { %v578_v45 = vmul.f32 -1.442695, %v335_v38  ;;  %v580_v46 = vmul.f32 -1.442695, %v337_v39  ;;  %v339_v50 = vadd.f32 %v328_v48, %v253_v43  ;;  %v255_v51 = vpop.f32.mrb[3].mxu0  ;;  %v306_v52 = vpop.f32.mrb[3].mxu1  ;;  %v341_v53 = vadd.f32 %v328_v48, %v304_v44 }
  0xee   :  { %v579_v49 = vmul.f32 -1.442695, %v336_v42  ;;  %v368_v54 = vsel %vm365_vm4, %v335_v38, 0.0  ;;  %v581_v55 = vmul.f32 -1.442695, %v338_v47  ;;  %v370_v58 = vsel %vm365_vm4, %v337_v39, 0.0 }
  0xef   :  { %617 = vpow2.f32 %v578_v45  ;;  %v582_v59 = vmul.f32 -1.442695, %v339_v50  ;;  %v380_v62 = vmul.f32 1.442695, %v368_v54  ;;  %v584_v63 = vmul.f32 -1.442695, %v341_v53 }
  0xf0   :  { %619 = vpow2.f32 %v580_v46  ;;  %v340_v0 = vadd.f32 %v328_v48, %v255_v51  ;;  %v384_v6 = vmul.f32 1.442695, %v370_v58  ;;  %v369_v10 = vsel %vm365_vm4, %v336_v42, 0.0  ;;  %v476_v39 = vld [vmem:[%s964_s7] sm:$0xff]  ;;  %v478_v45 = vld [vmem:[%s964_s7 + $0x10] sm:$0xff] }
  0xf1   :  { %621 = vpow2.f32 %v579_v49  ;;  %v342_v11 = vadd.f32 %v328_v48, %v306_v52  ;;  %v382_v18 = vmul.f32 1.442695, %v369_v10  ;;  %v371_v19 = vsel %vm365_vm4, %v338_v47, 0.0  ;;  %v851_v52 = vpop.permute.xlu1 %363 }
  0xf2   :  { %v259_v56 = vpop.f32.mrb[8].mxu0  ;;  %v310_v57 = vpop.f32.mrb[8].mxu1  ;;  %623 = vpow2.f32 %v581_v55  ;;  %v583_v15 = vmul.f32 -1.442695, %v340_v0  ;;  %v386_v23 = vmul.f32 1.442695, %v371_v19 }
  0xf3   :  { %v261_v60 = vpop.f32.mrb[9].mxu0  ;;  %v312_v61 = vpop.f32.mrb[9].mxu1  ;;  %v260_v1 = vadd.f32 %v259_v56, %v123_v26  ;;  %v311_v2 = vadd.f32 %v310_v57, %v174_v27  ;;  %625 = vpow2.f32 %v582_v59  ;;  %v585_v20 = vmul.f32 -1.442695, %v342_v11  ;;  %v482_v19 = vld [vmem:[%s964_s7 + $0x30] sm:$0xff] }
  0xf4   :  { %v262_v3 = vadd.f32 %v261_v60, %v125_v28  ;;  %v263_v4 = vpop.f32.mrb[10].mxu0  ;;  %v314_v5 = vpop.f32.mrb[10].mxu1  ;;  %v313_v7 = vadd.f32 %v312_v61, %v176_v29  ;;  %627 = vpow2.f32 %v380_v62  ;;  %v372_v26 = vsel %vm366_vm5, %v339_v50, 0.0 }
  0xf5   :  { %v264_v8 = vpop.f32.mrb[11].mxu0  ;;  %v315_v9 = vpop.f32.mrb[11].mxu1  ;;  %629 = vpow2.f32 %v584_v63  ;;  %v823_v21 = vadd.f32 %v806_v25, %v260_v1  ;;  %v829_v29 = vadd.f32 %v806_v25, %v311_v2  ;;  %v388_v32 = vmul.f32 1.442695, %v372_v26 }
  0xf6   :  { %631 = vpow2.f32 %v384_v6  ;;  %v374_v33 = vsel %vm366_vm5, %v341_v53, 0.0  ;;  %v834_v34 = vadd.f32 %v806_v25, %v262_v3  ;;  %v373_v44 = vsel %vm366_vm5, %v340_v0, 0.0  ;;  %v518_v59 = vpop.permute.xlu0 %517  ;;  %v479_v3 = vld [vmem:[%s964_s7 + $0x18] sm:$0xff]  ;;  %v480_v9 = vld [vmem:[%s964_s7 + $0x20] sm:$0xff] }
  0xf7   :  { %v586_v28 = vmul.f32 -1.442695, %v823_v21  ;;  %v588_v40 = vmul.f32 -1.442695, %v829_v29  ;;  %v392_v42 = vmul.f32 1.442695, %v374_v33  ;;  %v849_v49 = vadd.f32 %v806_v25, %v313_v7 }
  0xf8   :  { %v375_v47 = vsel %vm366_vm5, %v342_v11, 0.0  ;;  %v587_v48 = vmul.f32 -1.442695, %v834_v34  ;;  %v390_v54 = vmul.f32 1.442695, %v373_v44  ;;  %vm367_vm6 = vcmp.eq.s32.totalorder %v851_v52, 1 }
  0xf9   :  { %v618_v12 = vpop.eup %617  ;;  %v394_v58 = vmul.f32 1.442695, %v375_v47  ;;  %v477_v25 = vld [vmem:[%s964_s7 + $0x8] sm:$0xff]  ;;  %v589_v0 = vmul.f32 -1.442695, %v849_v49  ;;  %v376_v5 = vsel %vm367_vm6, %v823_v21, 0.0 }
  0xfa   :  { %v620_v13 = vpop.eup %619  ;;  %v440_v14 = vadd.f32 1.0, %v618_v12  ;;  %v481_v33 = vld [vmem:[%s964_s7 + $0x28] sm:$0xff]  ;;  %v379_v44 = vsel %vm367_vm6, %v849_v49, 0.0  ;;  %v528_v16 = vpop.permute.xlu0 %527 }
  0xfb   :  { %v442_v17 = vadd.f32 1.0, %v620_v13  ;;  %v622_v22 = vpop.eup %621  ;;  %v396_v13 = vmul.f32 1.442695, %v376_v5 }
  0xfc   :  { %633 = vrcp.f32 %v440_v14  ;;  %v441_v24 = vadd.f32 1.0, %v622_v22  ;;  %v624_v27 = vpop.eup %623 }
  0xfd   :  { %635 = vrcp.f32 %v442_v17  ;;  %v443_v30 = vadd.f32 1.0, %v624_v27  ;;  %v626_v31 = vpop.eup %625 }
  0xfe   :  { %637 = vpow2.f32 %v583_v15  ;;  %v628_v36 = vpop.eup %627  ;;  %v444_v37 = vadd.f32 1.0, %v626_v31 }
  0xff   :  { %639 = vpow2.f32 %v382_v18  ;;  %v630_v38 = vpop.eup %629  ;;  %v378_v18 = vsel %vm367_vm6, %v829_v29, 0.0  ;;  %v523_v29 = vpop.permute.xlu1 %522 }
 0x100   :  { %641 = vpow2.f32 %v585_v20  ;;  %v632_v41 = vpop.eup %631  ;;  %v446_v43 = vadd.f32 1.0, %v630_v38  ;;  %v400_v27 = vmul.f32 1.442695, %v378_v18 }
 0x101   :  { %643 = vrcp.f32 %v441_v24 }
 0x102   :  { %645 = vpow2.f32 %v386_v23 }
 0x103   :  { %647 = vrcp.f32 %v443_v30 }
 0x104   :  { %649 = vpow2.f32 %v586_v28  ;;  %v377_v28 = vsel %vm367_vm6, %v834_v34, 0.0 }
 0x105   :  { %651 = vrcp.f32 %v444_v37 }
 0x106   :  { %v634_v46 = vpop.eup %633  ;;  %653 = vpow2.f32 %v388_v32 }
 0x107   :  { %v636_v50 = vpop.eup %635  ;;  %655 = vrcp.f32 %v446_v43  ;;  %v488_v51 = vadd.f32 %v634_v46, %v476_v39  ;;  %v398_v39 = vmul.f32 1.442695, %v377_v28 }
 0x108   :  { %v638_v53 = vpop.eup %637  ;;  %v490_v55 = vadd.f32 %v636_v50, %v478_v45  ;;  %657 = vpow2.f32 %v588_v40 }
 0x109   :  { %v640_v56 = vpop.eup %639  ;;  %659 = vpow2.f32 %v392_v42  ;;  %v445_v57 = vadd.f32 1.0, %v638_v53  ;;  %v500_v60 = vsel %vm365_vm4, %v628_v36, %v488_v51  ;;  %v484_v53 = vld [vmem:[%s964_s7 + $0x40] sm:$0x1f] }
 0x10a   :  { %v642_v61 = vpop.eup %641  ;;  %v502_v62 = vsel %vm365_vm4, %v632_v41, %v490_v55  ;;  %v530_v63 = vmul.f32 %v518_v59, %v500_v60  ;;  %661 = vpow2.f32 %v587_v48  ;;  %v483_v41 = vld [vmem:[%s964_s7 + $0x38] sm:$0xff]  ;;  %v486_v60 = vld [vmem:[%s964_s7 + $0x50] sm:$0x1f] }
 0x10b   :  { %v644_v1 = vpop.eup %643  ;;  %663 = vrcp.f32 %v445_v57  ;;  %v447_v2 = vadd.f32 1.0, %v642_v61  ;;  %v532_v4 = vmul.f32 %v518_v59, %v502_v62 }
 0x10c   :  { %v646_v6 = vpop.eup %645  ;;  %665 = vpow2.f32 %v390_v54  ;;  %v489_v7 = vadd.f32 %v644_v1, %v477_v25  ;;  %542 = vst [vmem:[%s965_s8] sm:$0xff] %v530_v63  ;;  %v402_v54 = vmul.f32 1.442695, %v379_v44 }
 0x10d   :  { %v648_v8 = vpop.eup %647  ;;  %667 = vrcp.f32 %v447_v2  ;;  %544 = vst [vmem:[%s965_s8 + $0x10] sm:$0xff] %v532_v4 }
 0x10e   :  { %v650_v10 = vpop.eup %649  ;;  %v491_v11 = vadd.f32 %v648_v8, %v479_v3  ;;  %v501_v12 = vsel %vm365_vm4, %v640_v56, %v489_v7  ;;  %669 = vpow2.f32 %v589_v0  ;;  %v485_v0 = vld [vmem:[%s964_s7 + $0x48] sm:$0x1f]  ;;  %v487_v8 = vld [vmem:[%s964_s7 + $0x58] sm:$0x1f] }
 0x10f   :  { %v652_v14 = vpop.eup %651  ;;  %671 = vpow2.f32 %v394_v58  ;;  %v531_v15 = vmul.f32 %v518_v59, %v501_v12  ;;  %v448_v17 = vadd.f32 1.0, %v650_v10 }
 0x110   :  { %v654_v20 = vpop.eup %653  ;;  %v503_v21 = vsel %vm365_vm4, %v646_v6, %v491_v11  ;;  %v492_v22 = vadd.f32 %v652_v14, %v480_v9 }
 0x111   :  { %v656_v23 = vpop.eup %655  ;;  %v533_v24 = vmul.f32 %v518_v59, %v503_v21  ;;  %543 = vst [vmem:[%s965_s8 + $0x8] sm:$0xff] %v531_v15  ;;  %673 = vrcp.f32 %v448_v17 }
 0x112   :  { %v658_v26 = vpop.eup %657  ;;  %v494_v30 = vadd.f32 %v656_v23, %v482_v19  ;;  %v504_v35 = vsel %vm366_vm5, %v654_v20, %v492_v22  ;;  %675 = vpow2.f32 %v396_v13 }
 0x113   :  { %v660_v31 = vpop.eup %659  ;;  %545 = vst [vmem:[%s965_s8 + $0x18] sm:$0xff] %v533_v24  ;;  %v450_v32 = vadd.f32 1.0, %v658_v26  ;;  %v534_v36 = vmul.f32 %v523_v29, %v504_v35 }
 0x114   :  { %v662_v37 = vpop.eup %661  ;;  %v506_v34 = vsel %vm366_vm5, %v660_v31, %v494_v30 }
 0x115   :  { %v664_v38 = vpop.eup %663  ;;  %677 = vrcp.f32 %v450_v32  ;;  %v449_v40 = vadd.f32 1.0, %v662_v37  ;;  %v536_v42 = vmul.f32 %v523_v29, %v506_v34  ;;  %546 = vst [vmem:[%s965_s8 + $0x20] sm:$0xff] %v534_v36 }
 0x116   :  { %v666_v43 = vpop.eup %665  ;;  %679 = vpow2.f32 %v400_v27  ;;  %v493_v45 = vadd.f32 %v664_v38, %v481_v33 }
 0x117   :  { %v668_v46 = vpop.eup %667  ;;  %681 = vrcp.f32 %v449_v40  ;;  %548 = vst [vmem:[%s965_s8 + $0x30] sm:$0xff] %v536_v42 }
 0x118   :  { %v670_v47 = vpop.eup %669  ;;  %v495_v48 = vadd.f32 %v668_v46, %v483_v41  ;;  %v505_v50 = vsel %vm366_vm5, %v666_v43, %v493_v45  ;;  %683 = vpow2.f32 %v398_v39 }
 0x119   :  { %v672_v51 = vpop.eup %671  ;;  %v451_v49 = vadd.f32 1.0, %v670_v47  ;;  %v535_v55 = vmul.f32 %v523_v29, %v505_v50 }
 0x11a   :  { %v507_v56 = vsel %vm366_vm5, %v672_v51, %v495_v48 }
 0x11b   :  { %v674_v57 = vpop.eup %673  ;;  %685 = vrcp.f32 %v451_v49  ;;  %v537_v58 = vmul.f32 %v523_v29, %v507_v56  ;;  %547 = vst [vmem:[%s965_s8 + $0x28] sm:$0xff] %v535_v55 }
 0x11c   :  { %v496_v25 = vadd.f32 %v674_v57, %v484_v53  ;;  %v676_v59 = vpop.eup %675  ;;  %687 = vpow2.f32 %v402_v54 }
 0x11d   :  { %549 = vst [vmem:[%s965_s8 + $0x38] sm:$0xff] %v537_v58 }
 0x11e   :  { %v508_v61 = vsel %vm367_vm6, %v676_v59, %v496_v25 }
 0x11f   :  { %v678_v62 = vpop.eup %677  ;;  %v538_v63 = vmul.f32 %v528_v16, %v508_v61 }
 0x120   :  { %v680_v1 = vpop.eup %679  ;;  %v498_v2 = vadd.f32 %v678_v62, %v486_v60 }
 0x121   :  { %v682_v3 = vpop.eup %681  ;;  %550 = vst [vmem:[%s965_s8 + $0x40] sm:$0x1f] %v538_v63 }
 0x122   :  { %v510_v4 = vsel %vm367_vm6, %v680_v1, %v498_v2  ;;  %v497_v5 = vadd.f32 %v682_v3, %v485_v0  ;;  %v684_v6 = vpop.eup %683 }
 0x123   :  { %v540_v7 = vmul.f32 %v528_v16, %v510_v4 }
 0x124   :  { %v509_v9 = vsel %vm367_vm6, %v684_v6, %v497_v5 }
 0x125   :  { %v686_v10 = vpop.eup %685  ;;  %552 = vst [vmem:[%s965_s8 + $0x50] sm:$0x1f] %v540_v7  ;;  %v539_v11 = vmul.f32 %v528_v16, %v509_v9 }
 0x126   :  { %v499_v12 = vadd.f32 %v686_v10, %v487_v8  ;;  %v688_v13 = vpop.eup %687 }
 0x127   :  { %551 = vst [vmem:[%s965_s8 + $0x48] sm:$0x1f] %v539_v11 }
 0x128   :  { %v511_v14 = vsel %vm367_vm6, %v688_v13, %v499_v12 }
 0x129   :  { %v541_v15 = vmul.f32 %v528_v16, %v511_v14 }
 0x12b   :  { %553 = vst [vmem:[%s965_s8 + $0x58] sm:$0x1f] %v541_v15 }

// kernel: _forward.11
= control target key start
LH: loop header
LB: loop body
LE: loop exit
PB: predicated region body
PF: predicated region fallthrough
CT: control target
= control target key end

     0   :  { %vm61_vm0 = vcmask 130048   ;;  %v242_v1 = vmov 0   ;;  %s340_s0 = inlined_call_operand.vmem [shape: bf16[16,128], index: 0, kind: input, shape index: {}]   ;;  %s341_s1 = inlined_call_operand.vmem [shape: bf16[21,16], index: 1, kind: input, shape index: {}]   ;;  %s342_s2 = inlined_call_operand.vmem [shape: f32[21,1], index: 2, kind: input, shape index: {}]   ;;  %s343_s3 = inlined_call_operand.vmem [shape: f32[21,1], index: 3, kind: input, shape index: {}]   ;;  %s344_s4 = inlined_call_operand.vmem [shape: f32[21,1], index: 4, kind: input, shape index: {}]   ;;  %s345_s5 = inlined_call_operand.vmem [shape: f32[21,128], index: 5, kind: input, shape index: {}]   ;;  %s346_s6 = inlined_call_operand.vmem [shape: f32[21,128], index: 6, kind: output, shape index: {}]  }
   0x1   :  { %v221_v0 = vld [vmem:[%s340_s0] sm:$0xff]   ;;  %219 = vset.pattern.permute.xlu0 %v242_v1  ;;  %220 = vset.pattern.permute.xlu1 %v242_v1  ;;  %v223_v3 = vld [vmem:[%s341_s1 + $0x8] ss:$0 sps:$4 sm:$0x77]   ;;  %v31_v5 = vld [vmem:[%s342_s2 + $0x10] sm:$0x1f] }
   0x2   :  { %212 = vmatprep.subr.bf16.mxu0 %v221_v0  ;;  %v222_v2 = vld [vmem:[%s341_s1] sm:$0xff]   ;;  %v117_v6 = vld [vmem:[%s343_s3 + $0x8] sm:$0xff]  ;;  %44 = vperm.xlu1 %220, %v31_v5   ;;  %v118_v9 = vld [vmem:[%s343_s3 + $0x10] sm:$0x1f] }
   0x3   :  { %v29_v4 = vld [vmem:[%s342_s2] sm:$0xff]  ;;  %213 = vmatpush3.bf16.msra.mxu0 %v221_v0  ;;  %214 = vmatprep.mubr.msk.bf16.mxu0 %vm61_vm0, %v222_v2  ;;  %v30_v7 = vld [vmem:[%s342_s2 + $0x8] sm:$0xff]  ;;  %vm120_vm1 = vcmp.gt.f32.partialorder %v117_v6, 0.0  ;;  %vm121_vm3 = vcmp.gt.f32.partialorder %v118_v9, 0.0  ;;  %v175_v15 = vld [vmem:[%s344_s4 + $0x10] sm:$0x1f] }
   0x4   :  { %34 = vperm.xlu0 %219, %v29_v4   ;;  %v116_v8 = vld [vmem:[%s343_s3] sm:$0xff]  ;;  %v123_v11 = vsel %vm120_vm1, 1, %v242_v1  ;;  %v124_v12 = vsel %vm121_vm3, 1, %v242_v1  ;;  %v174_v14 = vld [vmem:[%s344_s4 + $0x8] sm:$0xff]  ;;  %v166_v45 = vld [vmem:[%s345_s5 + $0x10] sm:$0x1f] }
   0x5   :  { %vm119_vm2 = vcmp.gt.f32.partialorder %v116_v8, 0.0  ;;  %v173_v13 = vld [vmem:[%s344_s4] sm:$0xff]  ;;  %v165_v53 = vld [vmem:[%s345_s5 + $0x8] sm:$0xff] }
   0x6   :  { %215 = vmatmul.mubr.msk.bf16.vlgmr.msra.gmra.mrb[0].mxu0 %vm61_vm0, %v223_v3  ;;  %v122_v10 = vsel %vm119_vm2, 1, %v242_v1  ;;  %v164_v48 = vld [vmem:[%s345_s5] sm:$0xff] }
   0x7   :  { %126 = vperm.xlu1 %220, %v122_v10  }
   0x8   :  { %39 = vperm.xlu0 %219, %v30_v7  }
   0xb   :  { %132 = vperm.xlu1 %220, %v124_v12  }
   0xc   :  { %129 = vperm.xlu0 %219, %v123_v11  }
   0xf   :  { %183 = vperm.xlu1 %220, %v174_v14  }
  0x10   :  { %178 = vperm.xlu0 %219, %v173_v13  }
  0x14   :  { %188 = vperm.xlu0 %219, %v175_v15  }
  0x81   :  { %v45_v17 = vpop.permute.xlu1 %44 }
  0x83   :  { %v35_v16 = vpop.permute.xlu0 %34 }
  0x86   :  { %v127_v24 = vpop.permute.xlu1 %126 }
  0x87   :  { %v40_v21 = vpop.permute.xlu0 %39  ;;  %vm134_vm5 = vcmp.eq.s32.totalorder %v127_v24, 1 }
  0x8a   :  { %v133_v30 = vpop.permute.xlu1 %132 }
  0x8b   :  { %vm136_vm4 = vcmp.eq.s32.totalorder %v133_v30, 1  ;;  %v130_v34 = vpop.permute.xlu0 %129 }
  0x8c   :  { %vm135_vm6 = vcmp.eq.s32.totalorder %v130_v34, 1 }
  0x8e   :  { %v184_v62 = vpop.permute.xlu1 %183 }
  0x8f   :  { %v179_v44 = vpop.permute.xlu0 %178 }
  0x93   :  { %v189_v51 = vpop.permute.xlu0 %188 }
  0xd9   :  { %v216_v18 = vpop.f32.mrb[0].mxu0 }
  0xda   :  { %v111_v19 = vadd.f32 %v216_v18, %v45_v17  ;;  %v102_v20 = vpop.f32.mrb[1].mxu0 }
  0xdb   :  { %v103_v22 = vadd.f32 %v102_v20, %v35_v16  ;;  %v217_v23 = vpop.f32.mrb[2].mxu0 }
  0xdc   :  { %v208_v25 = vmul.f32 -1.442695, %v111_v19  ;;  %v105_v26 = vpop.f32.mrb[3].mxu0  ;;  %v139_v31 = vsel %vm136_vm4, %v111_v19, 0.0 }
  0xdd   :  { %v206_v27 = vmul.f32 -1.442695, %v103_v22  ;;  %v106_v28 = vadd.f32 %v105_v26, %v40_v21  ;;  %v137_v33 = vsel %vm134_vm5, %v103_v22, 0.0  ;;  %v144_v35 = vmul.f32 1.442695, %v139_v31 }
  0xde   :  { %224 = vpow2.f32 %v208_v25  ;;  %v140_v38 = vmul.f32 1.442695, %v137_v33 }
  0xdf   :  { %v207_v29 = vmul.f32 -1.442695, %v106_v28  ;;  %226 = vpow2.f32 %v206_v27  ;;  %v138_v39 = vsel %vm135_vm6, %v106_v28, 0.0 }
  0xe0   :  { %v142_v42 = vmul.f32 1.442695, %v138_v39 }
  0xe1   :  { %228 = vpow2.f32 %v207_v29 }
  0xe8   :  { %v225_v32 = vpop.eup %224 }
  0xe9   :  { %v157_v36 = vadd.f32 1.0, %v225_v32  ;;  %v227_v37 = vpop.eup %226 }
  0xea   :  { %v155_v40 = vadd.f32 1.0, %v227_v37 }
  0xeb   :  { %230 = vrcp.f32 %v157_v36  ;;  %v229_v41 = vpop.eup %228 }
  0xec   :  { %232 = vpow2.f32 %v144_v35  ;;  %v156_v43 = vadd.f32 1.0, %v229_v41 }
  0xed   :  { %234 = vrcp.f32 %v155_v40 }
  0xee   :  { %236 = vpow2.f32 %v140_v38 }
  0xef   :  { %238 = vrcp.f32 %v156_v43 }
  0xf0   :  { %240 = vpow2.f32 %v142_v42 }
  0xf5   :  { %v231_v46 = vpop.eup %230 }
  0xf6   :  { %v169_v47 = vadd.f32 %v231_v46, %v166_v45  ;;  %v233_v49 = vpop.eup %232 }
  0xf7   :  { %v235_v50 = vpop.eup %234 }
  0xf8   :  { %v172_v52 = vsel %vm136_vm4, %v233_v49, %v169_v47  ;;  %v237_v54 = vpop.eup %236  ;;  %v167_v56 = vadd.f32 %v235_v50, %v164_v48 }
  0xf9   :  { %v193_v55 = vmul.f32 %v189_v51, %v172_v52  ;;  %v239_v57 = vpop.eup %238 }
  0xfa   :  { %v170_v58 = vsel %vm134_vm5, %v237_v54, %v167_v56  ;;  %v168_v59 = vadd.f32 %v239_v57, %v165_v53  ;;  %v241_v60 = vpop.eup %240 }
  0xfb   :  { %196 = vst [vmem:[%s346_s6 + $0x10] sm:$0x1f] %v193_v55  ;;  %v191_v61 = vmul.f32 %v179_v44, %v170_v58 }
  0xfc   :  { %v171_v63 = vsel %vm135_vm6, %v241_v60, %v168_v59 }
  0xfd   :  { %194 = vst [vmem:[%s346_s6] sm:$0xff] %v191_v61  ;;  %v192_v0 = vmul.f32 %v184_v62, %v171_v63 }
  0xff   :  { %195 = vst [vmem:[%s346_s6 + $0x8] sm:$0xff] %v192_v0 }

</bundles_post_ra>
